<compile_context>
chip_gen: v5e
topology: v5e:2x2
jax: 0.10.0
libtpu: 0.0.40
codegen_flags: <defaults>
</compile_context>

<pallas_src>
import math

import jax
import jax.numpy as jnp
import numpy as np
from jax.experimental import pallas as pl
from jax.experimental.pallas import tpu as pltpu

LN_EPS = 1e-5
MASK_FILL = -1000000000.0


def _layernorm(v, g, b):
    # One-pass LayerNorm: var = E[x^2] - mu^2 (saves a (rows, D) VPU pass).
    # f32 activations at pre-LN scale -> cancellation is not a concern here.
    mu = jnp.mean(v, axis=-1, keepdims=True)
    ex2 = jnp.mean(v * v, axis=-1, keepdims=True)
    var = ex2 - mu * mu
    return (v - mu) * jax.lax.rsqrt(var + LN_EPS) * g + b


def transformer_block_kernel(
    x_ref, maskb_ref, vec_ref,
    wqkv_ref, bqkv_ref, wo_ref, w1_ref, b1_ref, w2_ref,
    out_ref, attn_ref,
):
    TB, S, D = x_ref.shape
    bf16 = jnp.bfloat16

    x = x_ref[...].reshape(TB * S, D)        # (R, D) rows, R = TB*S
    vecs = vec_ref[...]                      # (6, D) packed vectors
    ln1_g, ln1_b = vecs[0:1], vecs[1:2]
    ln2_g, ln2_b = vecs[2:3], vecs[3:4]
    bo, b2 = vecs[4:5], vecs[5:6]

    # ---- norm_1 + fused QKV projection (bf16 MXU, f32 accumulation) ---------
    xn = _layernorm(x, ln1_g, ln1_b)
    qkv = jnp.dot(xn.astype(bf16), wqkv_ref[...],
                  preferred_element_type=jnp.float32) + bqkv_ref[...]
    # Lane-axis slices at multiples of D (D is a multiple of 128 here).
    q = qkv[:, 0 * D:1 * D].reshape(TB, S, D)
    k = qkv[:, 1 * D:2 * D].reshape(TB, S, D)
    v = qkv[:, 2 * D:3 * D].reshape(TB, S, D)

    # ---- scaled dot-product attention (per batch, contract last dims) ------
    # The 1/sqrt(D) scale is already folded into Wq/bq at pack time.
    scores = jax.lax.dot_general(
        q.astype(bf16), k.astype(bf16),
        dimension_numbers=(((2,), (2,)), ((0,), (0,))),
        preferred_element_type=jnp.float32)               # (TB, S, S)
    scores = scores + maskb_ref[...]                       # additive mask bias

    m = jnp.max(scores, axis=-1, keepdims=True)
    e = jnp.exp(scores - m)
    # approx reciprocal runs on the EUP slot; error ~2^-12, well within the
    # 1e-2 tolerance (returned attn rows sum to 1 up to that error).
    p = e * pl.reciprocal(jnp.sum(e, axis=-1, keepdims=True), approx=True)

    # TODO(synk): flash-style KV-tiled path (online softmax) for large S when
    # return_attn=False, to avoid the O(S^2) intermediates on v7x.
    attn = jax.lax.dot_general(
        p.astype(bf16), v.astype(bf16),
        dimension_numbers=(((2,), (1,)), ((0,), (0,))),
        preferred_element_type=jnp.float32)                # (TB, S, D)
    attn = attn.reshape(TB * S, D)
    attn_out = jnp.dot(attn.astype(bf16), wo_ref[...],
                       preferred_element_type=jnp.float32) + bo

    # dropout_1 == identity (eval mode)
    x2 = x + attn_out

    # ---- norm_2 + feed-forward ---------------------------------------------
    xn2 = _layernorm(x2, ln2_g, ln2_b)
    h = jnp.dot(xn2.astype(bf16), w1_ref[...],
                preferred_element_type=jnp.float32) + b1_ref[...]
    h = jnp.maximum(h, 0.0)                                # ReLU (FF dropout == identity)
    ff = jnp.dot(h.astype(bf16), w2_ref[...],
                 preferred_element_type=jnp.float32) + b2

    # dropout_2 == identity (eval mode)
    out_ref[...] = (x2 + ff).reshape(TB, S, D)
    if attn_ref is not None:
        attn_ref[...] = p.astype(attn_ref.dtype)


def _choose_batch_tile(B, S, target_rows=512):
    """Batches per grid step so each matmul sees ~target_rows MXU rows,
    while keeping enough grid steps for v7x megacore sharding + pipelining."""
    tb = max(1, min(B, max(1, target_rows // max(S, 1))))
    # >=2 steps so both v7x TensorCores get work; >=4 steps (when B allows)
    # so the BlockSpec pipeline can overlap x/out/attn DMAs with compute.
    min_steps = 4 if B >= 4 else (2 if B >= 2 else 1)
    tb = min(tb, max(1, B // min_steps))
    while B % tb:                      # keep the grid exact
        tb -= 1
    return tb


def _physical_vmem_bytes():
    try:
        info = pltpu.get_tpu_info()
        return int(getattr(info, "vmem_capacity_bytes", 64 << 20))
    except Exception:
        return 64 << 20                # conservative (v7x per-TC VMEM)


def _vmem_limit_bytes(TB, S, D, d_ff, attn_elem_bytes):
    R = TB * S
    weights = 2 * (D * 3 * D + D * D + D * d_ff + d_ff * D)   # bf16, single-buffered
    small = 4 * (6 * D + 3 * D + d_ff)                         # packed f32 vectors
    io_blocks = 4 * (2 * R * D) + 4 * (TB * S) + attn_elem_bytes * TB * S * S
    # f32 intermediates: qkv (R,3D), h (R,d_ff), ~3x (TB,S,S) scores/e/p, misc.
    inter = 4 * (R * 3 * D + R * d_ff + 3 * TB * S * S + 2 * R * D)
    est = weights + small + 2 * io_blocks + inter + (8 << 20)  # dbl-buffer IO + headroom
    cap = max(32 << 20, _physical_vmem_bytes() - (8 << 20))    # ~56 MiB v7x, ~120 MiB v5e/v6e
    return int(min(max(est, 16 << 20), cap))


def _resident_spec(shape):
    """Constant-index (weight) block: fetched once -> request single buffering."""
    idx = lambda *_: (0,) * len(shape)
    try:
        return pl.BlockSpec(shape, idx, pipeline_mode=pl.Buffered(1))
    except Exception:
        return pl.BlockSpec(shape, idx)


def prepack_params(params):
    """One-time packing of the module parameters (hoisted out of the forward)."""
    bf16 = jnp.bfloat16
    D = params["wq"].shape[0]
    scale = jnp.float32(1.0 / math.sqrt(D))
    # Fold the 1/sqrt(d_k) attention scale into the Q projection.
    w_qkv = jnp.concatenate(
        [params["wq"] * scale, params["wk"], params["wv"]], axis=1).astype(bf16)
    b_qkv = jnp.concatenate(
        [params["bq"] * scale, params["bk"], params["bv"]], axis=1)
    vecs = jnp.concatenate(
        [params["ln1_g"], params["ln1_b"], params["ln2_g"], params["ln2_b"],
         params["bo"], params["b2"]], axis=0)                  # (6, D) f32
    return {
        "w_qkv": w_qkv, "b_qkv": b_qkv,
        "wo": params["wo"].astype(bf16),
        "w1": params["w1"].astype(bf16), "b1": params["b1"],
        "w2": params["w2"].astype(bf16),
        # TODO(synk): fp8 storage for w1/w2 on v7x if tolerance allows.
        "vecs": vecs,
        "d_model": D, "d_ff": params["w1"].shape[1],
    }


def transformer_block(x, mask, packed, *, return_attn=True,
                      attn_dtype=jnp.float32, batch_tile=None):
    B, S, D = x.shape
    d_ff = packed["d_ff"]
    assert packed["d_model"] == D
    # S must be a sublane multiple so the (TB,S,D)<->(TB*S,D) reshapes and the
    # qkv lane slices stay layout no-ops.  TODO(synk): pad S to 8 otherwise.
    assert S % 8 == 0, "pad the sequence length to a multiple of 8"

    TB = batch_tile if batch_tile is not None else _choose_batch_tile(B, S)
    assert B % TB == 0
    grid = (B // TB,)

    # Additive mask bias: 0 where attend, -1e9 where masked.
    mask_bias = (mask.reshape(B, 1, S).astype(jnp.float32) - 1.0) * jnp.float32(-MASK_FILL)

    per_batch3 = lambda i: (i, 0, 0)

    in_specs = [
        pl.BlockSpec((TB, S, D), per_batch3),     # x
        pl.BlockSpec((TB, 1, S), per_batch3),     # additive key-mask bias
        _resident_spec((6, D)),                   # ln1_g/ln1_b/ln2_g/ln2_b/bo/b2
        _resident_spec((D, 3 * D)),               # fused Wq|Wk|Wv  (bf16, pre-scaled Q)
        _resident_spec((1, 3 * D)),               # fused bq|bk|bv
        _resident_spec((D, D)),                   # Wo (bf16)
        _resident_spec((D, d_ff)),                # W1 (bf16)
        _resident_spec((1, d_ff)),                # b1
        _resident_spec((d_ff, D)),                # W2 (bf16)
    ]
    out_specs = [pl.BlockSpec((TB, S, D), per_batch3)]
    out_shape = [jax.ShapeDtypeStruct((B, S, D), jnp.float32)]
    attn_bytes = 0
    if return_attn:
        out_specs.append(pl.BlockSpec((TB, S, S), per_batch3))
        out_shape.append(jax.ShapeDtypeStruct((B, S, S), attn_dtype))
        attn_bytes = jnp.dtype(attn_dtype).itemsize
        kernel = transformer_block_kernel
    else:
        kernel = lambda *refs: transformer_block_kernel(*refs, None)

    outs = pl.pallas_call(
        kernel,
        grid=grid,
        in_specs=in_specs,
        out_specs=tuple(out_specs),
        out_shape=tuple(out_shape),
        compiler_params=pltpu.CompilerParams(
            dimension_semantics=("parallel",),
            vmem_limit_bytes=_vmem_limit_bytes(TB, S, D, d_ff, attn_bytes)),
    )(x, mask_bias, packed["vecs"], packed["w_qkv"], packed["b_qkv"],
      packed["wo"], packed["w1"], packed["b1"], packed["w2"])

    return outs if return_attn else outs[0]


def reference(x, mask, p):
    """Pure-JAX f32 reference mirroring the PyTorch forward (eval mode)."""
    D = x.shape[-1]
    def ln(v, g, b):
        mu = v.mean(-1, keepdims=True)
        var = ((v - mu) ** 2).mean(-1, keepdims=True)
        return (v - mu) / jnp.sqrt(var + LN_EPS) * g + b
    xn = ln(x, p["ln1_g"], p["ln1_b"])
    q = xn @ p["wq"] + p["bq"]
    k = xn @ p["wk"] + p["bk"]
    v = xn @ p["wv"] + p["bv"]
    w = jnp.einsum("bsd,btd->bst", q, k) / math.sqrt(D)
    w = jnp.where(mask[:, None, :] == 0, MASK_FILL, w)
    pw = jax.nn.softmax(w, axis=-1)
    o = jnp.einsum("bst,btd->bsd", pw, v) @ p["wo"] + p["bo"]
    x2 = x + o
    xn2 = ln(x2, p["ln2_g"], p["ln2_b"])
    ff = jnp.maximum(xn2 @ p["w1"] + p["b1"], 0.0) @ p["w2"] + p["b2"]
    return x2 + ff, pw


def make_params(key, d_model, d_ff):
    ks = jax.random.split(key, 12)
    s = 0.02
    f32 = jnp.float32
    return {
        "ln1_g": jnp.ones((1, d_model), f32),
        "ln1_b": jnp.zeros((1, d_model), f32),
        "ln2_g": jnp.ones((1, d_model), f32),
        "ln2_b": jnp.zeros((1, d_model), f32),
        "wq": jax.random.normal(ks[0], (d_model, d_model), f32) * s,
        "bq": jax.random.normal(ks[1], (1, d_model), f32) * s,
        "wk": jax.random.normal(ks[2], (d_model, d_model), f32) * s,
        "bk": jax.random.normal(ks[3], (1, d_model), f32) * s,
        "wv": jax.random.normal(ks[4], (d_model, d_model), f32) * s,
        "bv": jax.random.normal(ks[5], (1, d_model), f32) * s,
        "wo": jax.random.normal(ks[6], (d_model, d_model), f32) * s,
        "bo": jax.random.normal(ks[7], (1, d_model), f32) * s,
        "w1": jax.random.normal(ks[8], (d_model, d_ff), f32) * s,
        "b1": jax.random.normal(ks[9], (1, d_ff), f32) * s,
        "w2": jax.random.normal(ks[10], (d_ff, d_model), f32) * s,
        "b2": jax.random.normal(ks[11], (1, d_model), f32) * s,
    }


if __name__ == "__main__":
    B, S, D = 2, 8, 128      # batch, seq, d_model (d_model=128 for lane alignment)
    D_FF = 1024              # FeedForward default d_ff

    key = jax.random.PRNGKey(0)
    kx, kp = jax.random.split(key)
    x = jax.random.normal(kx, (B, S, D), jnp.float32)
    # mask: 1 = attend, 0 = masked (padding) key positions
    lengths = jnp.array([S, 5], dtype=jnp.int32)
    mask = (jnp.arange(S)[None, :] < lengths[:, None]).astype(jnp.float32)  # (B, S)

    params = make_params(kp, D, D_FF)
    packed = prepack_params(params)       # one-time operand packing

    out, attn_w = transformer_block(x, mask, packed, return_attn=True,
                                    attn_dtype=jnp.bfloat16)
    jax.block_until_ready((out, attn_w))

    ref_out, ref_attn = reference(x, mask, params)
    out_np = np.asarray(out)
    attn_np = np.asarray(attn_w).astype(np.float32)
    out_err = float(np.max(np.abs(out_np - np.asarray(ref_out))))
    attn_err = float(np.max(np.abs(attn_np - np.asarray(ref_attn))))
    # Tolerance reflects intentional bf16 weights/activations at the MXU
    # boundaries (f32 accumulation) and the bf16 attention-weight output;
    # structural errors would be O(0.1-1).
    ok = (np.allclose(out_np, np.asarray(ref_out), rtol=1e-2, atol=1e-2)
          and np.allclose(attn_np, np.asarray(ref_attn), rtol=1e-2, atol=1e-2))
    if not ok:
        raise AssertionError(
            f"Pallas kernel output mismatch vs reference "
            f"(max |dout|={out_err:.3e}, max |dattn|={attn_err:.3e})")

    print("KERNEL_OK")
</pallas_src>

<mosaic_0001>
module attributes {stable_mosaic.version = 11 : i64} {
  func.func @transformer_block_kernel(%arg0: i32, %arg1: memref<1x8x128xf32, #tpu.memory_space<vmem>>, %arg2: memref<1x1x8xf32, #tpu.memory_space<vmem>>, %arg3: memref<6x128xf32, #tpu.memory_space<vmem>>, %arg4: memref<128x384xbf16, #tpu.memory_space<vmem>>, %arg5: memref<1x384xf32, #tpu.memory_space<vmem>>, %arg6: memref<128x128xbf16, #tpu.memory_space<vmem>>, %arg7: memref<128x1024xbf16, #tpu.memory_space<vmem>>, %arg8: memref<1x1024xf32, #tpu.memory_space<vmem>>, %arg9: memref<1024x128xbf16, #tpu.memory_space<vmem>>, %arg10: memref<1x8x128xf32, #tpu.memory_space<vmem>>, %arg11: memref<1x8x8xbf16, #tpu.memory_space<vmem>>) attributes {dimension_semantics = [#tpu.dimension_semantics<parallel>], iteration_bounds = array<i64: 2>, scalar_prefetch = 0 : i64, scratch_operands = 0 : i64, tpu.core_type = #tpu.core_type<tc>, window_params = [{transform_indices = @transform_0, window_bounds = array<i64: 1, 8, 128>}, {transform_indices = @transform_1, window_bounds = array<i64: 1, 1, 8>}, {pipeline_mode = #tpu.pipeline_mode<synchronous>, transform_indices = @transform_2, window_bounds = array<i64: 6, 128>}, {pipeline_mode = #tpu.pipeline_mode<synchronous>, transform_indices = @transform_3, window_bounds = array<i64: 128, 384>}, {pipeline_mode = #tpu.pipeline_mode<synchronous>, transform_indices = @transform_4, window_bounds = array<i64: 1, 384>}, {pipeline_mode = #tpu.pipeline_mode<synchronous>, transform_indices = @transform_5, window_bounds = array<i64: 128, 128>}, {pipeline_mode = #tpu.pipeline_mode<synchronous>, transform_indices = @transform_6, window_bounds = array<i64: 128, 1024>}, {pipeline_mode = #tpu.pipeline_mode<synchronous>, transform_indices = @transform_7, window_bounds = array<i64: 1, 1024>}, {pipeline_mode = #tpu.pipeline_mode<synchronous>, transform_indices = @transform_8, window_bounds = array<i64: 1024, 128>}, {transform_indices = @transform_9, window_bounds = array<i64: 1, 8, 128>}, {transform_indices = @transform_10, window_bounds = array<i64: 1, 8, 8>}]} {
    %c0 = arith.constant 0 : index
    %c0_0 = arith.constant 0 : index
    %c0_1 = arith.constant 0 : index
    %0 = vector.load %arg1[%c0, %c0_0, %c0_1] : memref<1x8x128xf32, #tpu.memory_space<vmem>>, vector<1x8x128xf32>
    %1 = vector.shape_cast %0 : vector<1x8x128xf32> to vector<8x128xf32>
    %c0_2 = arith.constant 0 : index
    %c0_3 = arith.constant 0 : index
    %2 = vector.load %arg3[%c0_2, %c0_3] : memref<6x128xf32, #tpu.memory_space<vmem>>, vector<6x128xf32>
    %3 = vector.extract_strided_slice %2 {offsets = [0, 0], sizes = [1, 128], strides = [1, 1]} : vector<6x128xf32> to vector<1x128xf32>
    %4 = vector.extract_strided_slice %2 {offsets = [1, 0], sizes = [1, 128], strides = [1, 1]} : vector<6x128xf32> to vector<1x128xf32>
    %5 = vector.extract_strided_slice %2 {offsets = [2, 0], sizes = [1, 128], strides = [1, 1]} : vector<6x128xf32> to vector<1x128xf32>
    %6 = vector.extract_strided_slice %2 {offsets = [3, 0], sizes = [1, 128], strides = [1, 1]} : vector<6x128xf32> to vector<1x128xf32>
    %7 = vector.extract_strided_slice %2 {offsets = [4, 0], sizes = [1, 128], strides = [1, 1]} : vector<6x128xf32> to vector<1x128xf32>
    %8 = vector.extract_strided_slice %2 {offsets = [5, 0], sizes = [1, 128], strides = [1, 1]} : vector<6x128xf32> to vector<1x128xf32>
    %cst = arith.constant dense<0.000000e+00> : vector<8xf32>
    %9 = vector.multi_reduction <add>, %1, %cst [1] : vector<8x128xf32> to vector<8xf32>
    %10 = vector.shape_cast %9 : vector<8xf32> to vector<8x1xf32>
    %cst_4 = arith.constant 1.280000e+02 : f32
    %11 = vector.broadcast %cst_4 : f32 to vector<8x1xf32>
    %12 = arith.divf %10, %11 : vector<8x1xf32>
    %13 = arith.mulf %1, %1 : vector<8x128xf32>
    %cst_5 = arith.constant dense<0.000000e+00> : vector<8xf32>
    %14 = vector.multi_reduction <add>, %13, %cst_5 [1] : vector<8x128xf32> to vector<8xf32>
    %15 = vector.shape_cast %14 : vector<8xf32> to vector<8x1xf32>
    %cst_6 = arith.constant 1.280000e+02 : f32
    %16 = vector.broadcast %cst_6 : f32 to vector<8x1xf32>
    %17 = arith.divf %15, %16 : vector<8x1xf32>
    %18 = arith.mulf %12, %12 : vector<8x1xf32>
    %19 = arith.subf %17, %18 : vector<8x1xf32>
    %20 = vector.broadcast %12 : vector<8x1xf32> to vector<8x128xf32>
    %21 = arith.subf %1, %20 : vector<8x128xf32>
    %cst_7 = arith.constant 9.99999974E-6 : f32
    %22 = vector.broadcast %cst_7 : f32 to vector<8x1xf32>
    %23 = arith.addf %19, %22 : vector<8x1xf32>
    %24 = math.rsqrt %23 : vector<8x1xf32>
    %25 = vector.broadcast %24 : vector<8x1xf32> to vector<8x128xf32>
    %26 = arith.mulf %21, %25 : vector<8x128xf32>
    %27 = vector.broadcast %3 : vector<1x128xf32> to vector<8x128xf32>
    %28 = arith.mulf %26, %27 : vector<8x128xf32>
    %29 = vector.broadcast %4 : vector<1x128xf32> to vector<8x128xf32>
    %30 = arith.addf %28, %29 : vector<8x128xf32>
    %31 = arith.truncf %30 : vector<8x128xf32> to vector<8x128xbf16>
    %c0_8 = arith.constant 0 : index
    %c0_9 = arith.constant 0 : index
    %32 = vector.load %arg4[%c0_8, %c0_9] : memref<128x384xbf16, #tpu.memory_space<vmem>>, vector<128x384xbf16>
    %cst_10 = arith.constant dense<0.000000e+00> : vector<8x384xf32>
    %33 = tpu.matmul %31, %32, %cst_10 {dimension_numbers = #tpu.dot_dimension_numbers<[1], [0], [0], [1], [0, 0, 1, 1], [], []>} : vector<8x128xbf16>, vector<128x384xbf16>, vector<8x384xf32> -> vector<8x384xf32>
    %c0_11 = arith.constant 0 : index
    %c0_12 = arith.constant 0 : index
    %34 = vector.load %arg5[%c0_11, %c0_12] : memref<1x384xf32, #tpu.memory_space<vmem>>, vector<1x384xf32>
    %35 = vector.broadcast %34 : vector<1x384xf32> to vector<8x384xf32>
    %36 = arith.addf %33, %35 : vector<8x384xf32>
    %37 = vector.extract_strided_slice %36 {offsets = [0, 0], sizes = [8, 128], strides = [1, 1]} : vector<8x384xf32> to vector<8x128xf32>
    %38 = vector.shape_cast %37 : vector<8x128xf32> to vector<1x8x128xf32>
    %39 = vector.extract_strided_slice %36 {offsets = [0, 128], sizes = [8, 128], strides = [1, 1]} : vector<8x384xf32> to vector<8x128xf32>
    %40 = vector.shape_cast %39 : vector<8x128xf32> to vector<1x8x128xf32>
    %41 = vector.extract_strided_slice %36 {offsets = [0, 256], sizes = [8, 128], strides = [1, 1]} : vector<8x384xf32> to vector<8x128xf32>
    %42 = vector.shape_cast %41 : vector<8x128xf32> to vector<1x8x128xf32>
    %43 = arith.truncf %38 : vector<1x8x128xf32> to vector<1x8x128xbf16>
    %44 = arith.truncf %40 : vector<1x8x128xf32> to vector<1x8x128xbf16>
    %cst_13 = arith.constant dense<0.000000e+00> : vector<1x8x8xf32>
    %45 = tpu.matmul %43, %44, %cst_13 {dimension_numbers = #tpu.dot_dimension_numbers<[2], [2], [1], [1], [0, 0, 0, 1, 1, 1], [0], [0]>} : vector<1x8x128xbf16>, vector<1x8x128xbf16>, vector<1x8x8xf32> -> vector<1x8x8xf32>
    %c0_14 = arith.constant 0 : index
    %c0_15 = arith.constant 0 : index
    %c0_16 = arith.constant 0 : index
    %46 = vector.load %arg2[%c0_14, %c0_15, %c0_16] : memref<1x1x8xf32, #tpu.memory_space<vmem>>, vector<1x1x8xf32>
    %47 = vector.broadcast %46 : vector<1x1x8xf32> to vector<1x8x8xf32>
    %48 = arith.addf %45, %47 : vector<1x8x8xf32>
    %cst_17 = arith.constant dense<0xFF800000> : vector<1x8xf32>
    %49 = vector.multi_reduction <maximumf>, %48, %cst_17 [2] : vector<1x8x8xf32> to vector<1x8xf32>
    %50 = vector.shape_cast %49 : vector<1x8xf32> to vector<1x8x1xf32>
    %51 = vector.broadcast %50 : vector<1x8x1xf32> to vector<1x8x8xf32>
    %52 = arith.subf %48, %51 : vector<1x8x8xf32>
    %53 = math.exp %52 : vector<1x8x8xf32>
    %cst_18 = arith.constant dense<0.000000e+00> : vector<1x8xf32>
    %54 = vector.multi_reduction <add>, %53, %cst_18 [2] : vector<1x8x8xf32> to vector<1x8xf32>
    %55 = vector.shape_cast %54 : vector<1x8xf32> to vector<1x8x1xf32>
    %56 = tpu.reciprocal %55 {approx = true} : vector<1x8x1xf32> -> vector<1x8x1xf32>
    %57 = vector.broadcast %56 : vector<1x8x1xf32> to vector<1x8x8xf32>
    %58 = arith.mulf %53, %57 : vector<1x8x8xf32>
    %59 = arith.truncf %58 : vector<1x8x8xf32> to vector<1x8x8xbf16>
    %60 = arith.truncf %42 : vector<1x8x128xf32> to vector<1x8x128xbf16>
    %cst_19 = arith.constant dense<0.000000e+00> : vector<1x8x128xf32>
    %61 = tpu.matmul %59, %60, %cst_19 {dimension_numbers = #tpu.dot_dimension_numbers<[2], [1], [1], [2], [0, 0, 0, 1, 1, 2], [0], [0]>} : vector<1x8x8xbf16>, vector<1x8x128xbf16>, vector<1x8x128xf32> -> vector<1x8x128xf32>
    %62 = vector.shape_cast %61 : vector<1x8x128xf32> to vector<8x128xf32>
    %63 = arith.truncf %62 : vector<8x128xf32> to vector<8x128xbf16>
    %c0_20 = arith.constant 0 : index
    %c0_21 = arith.constant 0 : index
    %64 = vector.load %arg6[%c0_20, %c0_21] : memref<128x128xbf16, #tpu.memory_space<vmem>>, vector<128x128xbf16>
    %cst_22 = arith.constant dense<0.000000e+00> : vector<8x128xf32>
    %65 = tpu.matmul %63, %64, %cst_22 {dimension_numbers = #tpu.dot_dimension_numbers<[1], [0], [0], [1], [0, 0, 1, 1], [], []>} : vector<8x128xbf16>, vector<128x128xbf16>, vector<8x128xf32> -> vector<8x128xf32>
    %66 = vector.broadcast %7 : vector<1x128xf32> to vector<8x128xf32>
    %67 = arith.addf %65, %66 : vector<8x128xf32>
    %68 = arith.addf %1, %67 : vector<8x128xf32>
    %cst_23 = arith.constant dense<0.000000e+00> : vector<8xf32>
    %69 = vector.multi_reduction <add>, %68, %cst_23 [1] : vector<8x128xf32> to vector<8xf32>
    %70 = vector.shape_cast %69 : vector<8xf32> to vector<8x1xf32>
    %cst_24 = arith.constant 1.280000e+02 : f32
    %71 = vector.broadcast %cst_24 : f32 to vector<8x1xf32>
    %72 = arith.divf %70, %71 : vector<8x1xf32>
    %73 = arith.mulf %68, %68 : vector<8x128xf32>
    %cst_25 = arith.constant dense<0.000000e+00> : vector<8xf32>
    %74 = vector.multi_reduction <add>, %73, %cst_25 [1] : vector<8x128xf32> to vector<8xf32>
    %75 = vector.shape_cast %74 : vector<8xf32> to vector<8x1xf32>
    %cst_26 = arith.constant 1.280000e+02 : f32
    %76 = vector.broadcast %cst_26 : f32 to vector<8x1xf32>
    %77 = arith.divf %75, %76 : vector<8x1xf32>
    %78 = arith.mulf %72, %72 : vector<8x1xf32>
    %79 = arith.subf %77, %78 : vector<8x1xf32>
    %80 = vector.broadcast %72 : vector<8x1xf32> to vector<8x128xf32>
    %81 = arith.subf %68, %80 : vector<8x128xf32>
    %cst_27 = arith.constant 9.99999974E-6 : f32
    %82 = vector.broadcast %cst_27 : f32 to vector<8x1xf32>
    %83 = arith.addf %79, %82 : vector<8x1xf32>
    %84 = math.rsqrt %83 : vector<8x1xf32>
    %85 = vector.broadcast %84 : vector<8x1xf32> to vector<8x128xf32>
    %86 = arith.mulf %81, %85 : vector<8x128xf32>
    %87 = vector.broadcast %5 : vector<1x128xf32> to vector<8x128xf32>
    %88 = arith.mulf %86, %87 : vector<8x128xf32>
    %89 = vector.broadcast %6 : vector<1x128xf32> to vector<8x128xf32>
    %90 = arith.addf %88, %89 : vector<8x128xf32>
    %91 = arith.truncf %90 : vector<8x128xf32> to vector<8x128xbf16>
    %c0_28 = arith.constant 0 : index
    %c0_29 = arith.constant 0 : index
    %92 = vector.load %arg7[%c0_28, %c0_29] : memref<128x1024xbf16, #tpu.memory_space<vmem>>, vector<128x1024xbf16>
    %cst_30 = arith.constant dense<0.000000e+00> : vector<8x1024xf32>
    %93 = tpu.matmul %91, %92, %cst_30 {dimension_numbers = #tpu.dot_dimension_numbers<[1], [0], [0], [1], [0, 0, 1, 1], [], []>} : vector<8x128xbf16>, vector<128x1024xbf16>, vector<8x1024xf32> -> vector<8x1024xf32>
    %c0_31 = arith.constant 0 : index
    %c0_32 = arith.constant 0 : index
    %94 = vector.load %arg8[%c0_31, %c0_32] : memref<1x1024xf32, #tpu.memory_space<vmem>>, vector<1x1024xf32>
    %95 = vector.broadcast %94 : vector<1x1024xf32> to vector<8x1024xf32>
    %96 = arith.addf %93, %95 : vector<8x1024xf32>
    %cst_33 = arith.constant 0.000000e+00 : f32
    %97 = vector.broadcast %cst_33 : f32 to vector<8x1024xf32>
    %98 = arith.maximumf %96, %97 : vector<8x1024xf32>
    %99 = arith.truncf %98 : vector<8x1024xf32> to vector<8x1024xbf16>
    %c0_34 = arith.constant 0 : index
    %c0_35 = arith.constant 0 : index
    %100 = vector.load %arg9[%c0_34, %c0_35] : memref<1024x128xbf16, #tpu.memory_space<vmem>>, vector<1024x128xbf16>
    %cst_36 = arith.constant dense<0.000000e+00> : vector<8x128xf32>
    %101 = tpu.matmul %99, %100, %cst_36 {dimension_numbers = #tpu.dot_dimension_numbers<[1], [0], [0], [1], [0, 0, 1, 1], [], []>} : vector<8x1024xbf16>, vector<1024x128xbf16>, vector<8x128xf32> -> vector<8x128xf32>
    %102 = vector.broadcast %8 : vector<1x128xf32> to vector<8x128xf32>
    %103 = arith.addf %101, %102 : vector<8x128xf32>
    %104 = arith.addf %68, %103 : vector<8x128xf32>
    %105 = vector.shape_cast %104 : vector<8x128xf32> to vector<1x8x128xf32>
    %c0_37 = arith.constant 0 : index
    %c0_38 = arith.constant 0 : index
    %c0_39 = arith.constant 0 : index
    %106 = vector.load %arg10[%c0_37, %c0_38, %c0_39] : memref<1x8x128xf32, #tpu.memory_space<vmem>>, vector<1x8x128xf32>
    tpu.vector_store %arg10[%c0_37, %c0_38, %c0_39], %105 {strides = array<i32>} : memref<1x8x128xf32, #tpu.memory_space<vmem>>, vector<1x8x128xf32>,
    %107 = arith.truncf %58 : vector<1x8x8xf32> to vector<1x8x8xbf16>
    %c0_40 = arith.constant 0 : index
    %c0_41 = arith.constant 0 : index
    %c0_42 = arith.constant 0 : index
    %108 = vector.load %arg11[%c0_40, %c0_41, %c0_42] : memref<1x8x8xbf16, #tpu.memory_space<vmem>>, vector<1x8x8xbf16>
    tpu.vector_store %arg11[%c0_40, %c0_41, %c0_42], %107 {strides = array<i32>} : memref<1x8x8xbf16, #tpu.memory_space<vmem>>, vector<1x8x8xbf16>,
    return
  }
  func.func @transform_0(%arg0: i32) -> (i32, i32, i32) {
    %c0_i32 = arith.constant 0 : i32
    %c0_i32_0 = arith.constant 0 : i32
    %c0_i32_1 = arith.constant 0 : i32
    return %arg0, %c0_i32, %c0_i32_0 : i32, i32, i32
  }
  func.func @transform_1(%arg0: i32) -> (i32, i32, i32) {
    %c0_i32 = arith.constant 0 : i32
    %c0_i32_0 = arith.constant 0 : i32
    %c0_i32_1 = arith.constant 0 : i32
    return %arg0, %c0_i32, %c0_i32_0 : i32, i32, i32
  }
  func.func @transform_2(%arg0: i32) -> (i32, i32) {
    %c0_i32 = arith.constant 0 : i32
    %c0_i32_0 = arith.constant 0 : i32
    %c0_i32_1 = arith.constant 0 : i32
    return %c0_i32, %c0_i32_0 : i32, i32
  }
  func.func @transform_3(%arg0: i32) -> (i32, i32) {
    %c0_i32 = arith.constant 0 : i32
    %c0_i32_0 = arith.constant 0 : i32
    %c0_i32_1 = arith.constant 0 : i32
    return %c0_i32, %c0_i32_0 : i32, i32
  }
  func.func @transform_4(%arg0: i32) -> (i32, i32) {
    %c0_i32 = arith.constant 0 : i32
    %c0_i32_0 = arith.constant 0 : i32
    %c0_i32_1 = arith.constant 0 : i32
    return %c0_i32, %c0_i32_0 : i32, i32
  }
  func.func @transform_5(%arg0: i32) -> (i32, i32) {
    %c0_i32 = arith.constant 0 : i32
    %c0_i32_0 = arith.constant 0 : i32
    %c0_i32_1 = arith.constant 0 : i32
    return %c0_i32, %c0_i32_0 : i32, i32
  }
  func.func @transform_6(%arg0: i32) -> (i32, i32) {
    %c0_i32 = arith.constant 0 : i32
    %c0_i32_0 = arith.constant 0 : i32
    %c0_i32_1 = arith.constant 0 : i32
    return %c0_i32, %c0_i32_0 : i32, i32
  }
  func.func @transform_7(%arg0: i32) -> (i32, i32) {
    %c0_i32 = arith.constant 0 : i32
    %c0_i32_0 = arith.constant 0 : i32
    %c0_i32_1 = arith.constant 0 : i32
    return %c0_i32, %c0_i32_0 : i32, i32
  }
  func.func @transform_8(%arg0: i32) -> (i32, i32) {
    %c0_i32 = arith.constant 0 : i32
    %c0_i32_0 = arith.constant 0 : i32
    %c0_i32_1 = arith.constant 0 : i32
    return %c0_i32, %c0_i32_0 : i32, i32
  }
  func.func @transform_9(%arg0: i32) -> (i32, i32, i32) {
    %c0_i32 = arith.constant 0 : i32
    %c0_i32_0 = arith.constant 0 : i32
    %c0_i32_1 = arith.constant 0 : i32
    return %arg0, %c0_i32, %c0_i32_0 : i32, i32, i32
  }
  func.func @transform_10(%arg0: i32) -> (i32, i32, i32) {
    %c0_i32 = arith.constant 0 : i32
    %c0_i32_0 = arith.constant 0 : i32
    %c0_i32_1 = arith.constant 0 : i32
    return %arg0, %c0_i32, %c0_i32_0 : i32, i32, i32
  }
}

</mosaic_0001>

<bundles_post_ra>
// kernel: tpu_custom_call.1
= control target key start
LH: loop header
LB: loop body
LE: loop exit
PB: predicated region body
PF: predicated region fallthrough
CT: control target
= control target key end

     0   :  { %s3959_s0 = inlined_call_operand.hbm [shape: f32[2,8,128], index: 0, kind: input, shape index: {}]   ;;  %s3960_s1 = inlined_call_operand.hbm [shape: f32[2,1,8], index: 1, kind: input, shape index: {}]   ;;  %s3961_s2 = inlined_call_operand.hbm [shape: f32[6,128], index: 2, kind: input, shape index: {}]   ;;  %s3962_s3 = inlined_call_operand.hbm [shape: bf16[128,384], index: 3, kind: input, shape index: {}]   ;;  %s3963_s4 = inlined_call_operand.vmem [shape: f32[1,384], index: 4, kind: input, shape index: {}]   ;;  %s3964_s5 = inlined_call_operand.hbm [shape: bf16[128,128], index: 5, kind: input, shape index: {}]   ;;  %s3965_s6 = inlined_call_operand.hbm [shape: bf16[128,1024], index: 6, kind: input, shape index: {}]   ;;  %s3966_s7 = inlined_call_operand.hbm [shape: f32[1,1024], index: 7, kind: input, shape index: {}]   ;;  %s3967_s8 = inlined_call_operand.hbm [shape: bf16[1024,128], index: 8, kind: input, shape index: {}]   ;;  %s3968_s9 = inlined_call_operand.hbm [shape: f32[2,8,128], index: 9, kind: output, shape index: {0}]   ;;  %s3969_s10 = inlined_call_operand.hbm [shape: bf16[2,8,8], index: 10, kind: output, shape index: {1}]  }
   0x1   :  { %3971 = sst [smem:[#allocation29_spill]] %s3961_s2 }
   0x2   :  { %3972 = sst [smem:[#allocation30_spill]] %s3962_s3 }
   0x3   :  { %3973 = sst [smem:[#allocation31_spill]] %s3964_s5 }
   0x4   :  { %3974 = sst [smem:[#allocation32_spill]] %s3965_s6 }
   0x5   :  { %3975 = sst [smem:[#allocation33_spill]] %s3966_s7 }
   0x6   :  { %3976 = sst [smem:[#allocation34_spill]] %s3967_s8 }
   0x7   :  { %16 = vsyncpa [#allocation3], 0 }
   0x8   :  { %18 = vsyncpa [#allocation3 + $0x1], 0 }
   0x9   :  { %19 = vsyncpa [#allocation6], 0 }
   0xa   :  { %21 = vsyncpa [#allocation6 + $0x1], 0 }
   0xb   :  { %22 = vsyncpa [#allocation9], 0 }
   0xc   :  { %23 = vsyncpa [#allocation12], 0 }
   0xd   :  { %24 = vsyncpa [#allocation15], 0 }
   0xe   :  { %25 = vsyncpa [#allocation4], 0 }
   0xf   :  { %27 = vsyncpa [#allocation4 + $0x1], 0 }
  0x10   :  { %28 = vsyncpa [#allocation18], 0 }
  0x11   :  { %30 = vsyncpa [#allocation18 + $0x1], 0  ;;  %s3671_s13 = smov 0   ;;  %s3673_s14 = smov 0  }
  0x12   :  { %s3675_s15 = smov 0   ;;  %s3677_s16 = smov 0  }
  0x13 LB: > { %3977 = sst [smem:[#allocation27_spill]] %s3597_s15  ;;  %s3695_s20 = sadd.s32 4294967295, %s3601_s16   ;;  %s3601_s16 = sphi %s3677_s16, %s3997_s16   ;;  %s3597_s15 = sphi %s3675_s15, %s3994_s15   ;;  %s3593_s14 = sphi %s3673_s14, %s3996_s14   ;;  %s3589_s13 = sphi %s3671_s13, %s3995_s13  }
  0x14   : > { %s3978_s2 = sld [smem:[#allocation29_spill]]  ;;  %p2280_p0 = scmp.ge.s32.totalorder %s3601_s16, 1 }
  0x15   : > { %p57_p1 = scmp.eq.s32.totalorder %s3695_s20, 0  ;;  %p292_p2 = scmp.lt.s32.totalorder %s3601_s16, 3 }
  0x16   : > { %s3603_s22 = smov [#allocation7]   ;;  %s3980_s3 = sld [smem:[#allocation30_spill]] }
  0x17   : > { %p3700_p3 = pnand %p2280_p0, %p292_p2  ;;  %s306_s23 = sshll.u32 %s3603_s22, 4  ;;  %s307_s23 = int_to_ptr.vmem [resolvable:$true] %s306_s23 }
  0x18   : > { %s3604_s28 = smov [#allocation8]   ;;  %s3605_s30 = smov 192  }
  0x19   : > { %p3139_p5 = pneg %p3700_p3  ;;  %s317_s29 = sshll.u32 %s3604_s28, 4  ;;  %s318_s29 = int_to_ptr.vmem [resolvable:$true] %s317_s29 }
  0x1a   : > { %s304_s19 = sshll.u32 %s3978_s2, 4  ;;  %s3606_s11 = smov 12   ;;  %s305_s19 = int_to_ptr.hbm [resolvable:$true] %s304_s19 }
  0x1b   : > { %p3712_p6 = pnand %p3139_p5, %p57_p1  ;;  %s3982_s6 = sld [smem:[#allocation32_spill]] }
  0x1c   : > { %s315_s26 = sshll.u32 %s3980_s3, 4  ;;  %s3607_s22 = smov [#allocation11]   ;;  %s316_s26 = int_to_ptr.hbm [resolvable:$true] %s315_s26 }
  0x1d   : > { %3142 = dma.hbm_to_vmem [thread:$0]  (!%p3712_p6), %s305_s19, 128, %s307_s23, [#allocation6]  }
  0x1e   : > { %3145 = dma.hbm_to_vmem [thread:$0]  (!%p3712_p6), %s316_s26, 3072, %s318_s29, [#allocation9], %s3605_s30, %s3605_s30, %s3606_s11  }
  0x1f   : > { %s348_s24 = sshll.u32 %s3607_s22, 4  ;;  %s3983_s5 = sld [smem:[#allocation31_spill]]  ;;  %s349_s24 = int_to_ptr.vmem [resolvable:$true] %s348_s24 }
  0x20   : > { %s3608_s3 = smov 512   ;;  %s3609_s19 = smov 32  }
  0x21   : > { %s346_s18 = sshll.u32 %s3982_s6, 4  ;;  %s3610_s23 = smov [#allocation10]   ;;  %s347_s18 = int_to_ptr.hbm [resolvable:$true] %s346_s18 }
  0x22   : > { %3151 = dma.hbm_to_vmem [thread:$0]  (!%p3712_p6), %s347_s18, 8192, %s349_s24, [#allocation12], %s3608_s3, %s3608_s3, %s3609_s19  }
  0x23   : > { %s334_s26 = sshll.u32 %s3610_s23, 4  ;;  %s3611_s29 = smov 64   ;;  %s335_s26 = int_to_ptr.vmem [resolvable:$true] %s334_s26 }
  0x24   : > { %s3612_s30 = smov 4   ;;  %s3984_s7 = sld [smem:[#allocation33_spill]] }
  0x25   : > { %s332_s28 = sshll.u32 %s3983_s5, 4  ;;  %s3613_s3 = smov [#allocation13]   ;;  %s333_s28 = int_to_ptr.hbm [resolvable:$true] %s332_s28 }
  0x26   : > { %3148 = dma.hbm_to_vmem [thread:$0]  (!%p3712_p6), %s333_s28, 1024, %s335_s26, [#allocation9], %s3611_s29, %s3611_s29, %s3612_s30  }
  0x27   : > { %s363_s17 = sshll.u32 %s3613_s3, 4  ;;  %s3985_s8 = sld [smem:[#allocation34_spill]]  ;;  %s364_s17 = int_to_ptr.vmem [resolvable:$true] %s363_s17 }
  0x28   : > { %s3614_s25 = smov [#allocation14]   ;;  %s2279_s19 = sadd.s32 4294967294, %s3601_s16  }
  0x29   : > { %s374_s28 = sshll.u32 %s3614_s25, 4  ;;  %s3742_s23 = sadd.s32 1, %s3601_s16   ;;  %s375_s28 = int_to_ptr.vmem [resolvable:$true] %s374_s28 }
  0x2a   : > { %s361_s12 = sshll.u32 %s3984_s7, 4  ;;  %s40_s26 = ssub.s32 %s3601_s16, %s3742_s23  ;;  %s362_s12 = int_to_ptr.hbm [resolvable:$true] %s361_s12 }
  0x2b   : > { %3154 = dma.hbm_to_vmem [thread:$0]  (!%p3712_p6), %s362_s12, 128, %s364_s17, [#allocation12]  }
  0x2c   : > { %s43_s11 = sadd.s32 1, %s3597_s15  ;;  %p41_p7 = scmp.eq.s32.totalorder %s40_s26, 0 }
  0x2d   : > { %s372_s24 = sshll.u32 %s3985_s8, 4  ;;  %p50_p8 = scmp.ne.s32.totalorder %s3597_s15, %s3593_s14  ;;  %s373_s24 = int_to_ptr.hbm [resolvable:$true] %s372_s24 }
  0x2e   : > { %3157 = dma.hbm_to_vmem [thread:$0]  (!%p3712_p6), %s373_s24, 8192, %s375_s28, [#allocation15], %s3611_s29, %s3611_s29, %s3612_s30  }
  0x2f   : > { %p51_p9 = scmp.eq.s32.totalorder %s3601_s16, 0  ;;  %p56_p10 = scmp.ne.s32.totalorder %s3593_s14, %s3589_s13 }
  0x30   : > { %s3753_s2 = scalar_select %p41_p7, %s3597_s15, %s43_s11  }
  0x31   : > { %p3755_p11 = por %p51_p9, %p50_p8  ;;  %p3761_p12 = por %p57_p1, %p56_p10 }
  0x32   : > { %3986 = sst [smem:[#allocation28_spill]] %s3753_s2  ;;  %p253_p13 = scmp.eq.s32.totalorder %s3695_s20, 1 }
  0x33   : > { %p259_p0 = scmp.eq.s32.totalorder %s2279_s19, 1  ;;  %p3178_p2 = scmp.lt.s32.totalorder %s3601_s16, 2 }
  0x34   : > { %s3768_s29 = sand.u32 1, %s3597_s15   ;;  %p3770_p5 = por %p253_p13, %p50_p8 }
  0x35   : > { %p3774_p6 = por %p259_p0, %p56_p10  ;;  %s2288_s17 = sshll.u32 %s3768_s29, 3 }
  0x36   : > { %s2289_s18 = sshll.u32 %s3601_s16, 3  ;;  %s392_s28 = scalar_lea.vmem [#allocation2], %s2288_s17 }
  0x37   : > { %s396_s25 = scalar_lea.hbm %s3959_s0, %s2289_s18  ;;  %s400_s19 = sshll.u32 %s392_s28, 4  ;;  %s401_s19 = int_to_ptr.vmem [resolvable:$true] %s400_s19 }
  0x38   : > { %s398_s26 = sshll.u32 %s396_s25, 4  ;;  %p3785_p7 = pnand %p3178_p2, %p3755_p11  ;;  %s399_s26 = int_to_ptr.hbm [resolvable:$true] %s398_s26 }
  0x39   : > { %s407_s5 = sand.u32 1, %s3601_s16   ;;  %s389_s6 = scalar_lea.sflag [#allocation3], %s3768_s29 }
  0x3a   : > { %s3423_s7 = sshra.s32 %s399_s26, 4  ;;  %p3427_p9 = pneg %p3785_p7  ;;  %s3424_s7 = int_to_ptr.hbm [resolvable:$true] %s3423_s7 }
  0x3b   : > { %s3425_s8 = scalar_lea.hbm %s3424_s7, 8  ;;  %s3430_s18 = scalar_lea.hbm %s3959_s0, 16 }
  0x3c   : > { %p3426_p8 = scmp.ne.s32.totalorder %s3424_s7, %s3425_s8  ;;  %p3431_p11 = scmp.lt.s32.totalorder %s3424_s7, %s3959_s0 }
  0x3d   : > { %p3432_p0 = scmp.lt.s32.totalorder %s3430_s18, %s3425_s8 }
  0x3e   : > { %p3428_p10 = pnand %p3427_p9, %p3426_p8 }
  0x3f   : > { %p3433_p2 = por %p3432_p0, %p3431_p11 }
  0x40   : > { %p3429_p13 = pneg %p3428_p10 }
  0x42   : > { %p3434_p4 = pnand %p3433_p2, %p3429_p13 }
  0x44   : > { %3437 = shalt.err (!%p3434_p4)
}
  0x45   : > { %3161 = dma.hbm_to_vmem [thread:$0]  (!%p3785_p7), %s399_s26, 128, %s401_s19, %s389_s6  }
  0x46   : > { %s413_s2 = scalar_lea.hbm %s3960_s1, %s3601_s16  ;;  %s410_s17 = scalar_lea.vmem [#allocation5], %s3768_s29 }
  0x47   : > { %s417_s12 = sshll.u32 %s410_s17, 4  ;;  %s415_s15 = sshll.u32 %s413_s2, 4  ;;  %s418_s12 = int_to_ptr.vmem [resolvable:$true] %s417_s12  ;;  %s416_s15 = int_to_ptr.hbm [resolvable:$true] %s415_s15 }
  0x48   : > { %s408_s7 = scalar_lea.sflag [#allocation6], %s407_s5  ;;  %s3453_s8 = sshra.s32 %s416_s15, 4  ;;  %s3454_s8 = int_to_ptr.hbm [resolvable:$true] %s3453_s8 }
  0x49   : > { %s3455_s18 = scalar_lea.hbm %s3454_s8, 1  ;;  %s3460_s19 = scalar_lea.hbm %s3960_s1, 2 }
  0x4a   : > { %p3456_p4 = scmp.ne.s32.totalorder %s3454_s8, %s3455_s18  ;;  %p3461_p13 = scmp.lt.s32.totalorder %s3454_s8, %s3960_s1 }
  0x4b   : > { %p3462_p11 = scmp.lt.s32.totalorder %s3460_s19, %s3455_s18 }
  0x4c   : > { %p3458_p8 = pnand %p3456_p4, %p3427_p9 }
  0x4d   : > { %p3463_p0 = por %p3462_p11, %p3461_p13 }
  0x4e   : > { %p3459_p10 = pneg %p3458_p8 }
  0x50   : > { %p3464_p2 = pnand %p3463_p0, %p3459_p10 }
  0x52   : > { %3467 = shalt.err (!%p3464_p2)
}
  0x53   : > { %3164 = dma.hbm_to_vmem [thread:$0]  (!%p3785_p7), %s416_s15, 16, %s418_s12, %s408_s7  }
  0x54   : > { %426 = sbr.rel (%p3700_p3) target bundleno = 1502 (0x5de), region = 56  ;;  %s3823_s5 = sand.u32 (!%p3700_p3), 1, %s3593_s14  }
  0x55   : > { %s2291_s2 = sshll.u32 (!%p3700_p3), %s3823_s5, 3  ;;  %s429_s29 = scalar_lea.sflag (!%p3700_p3), [#allocation3], %s3823_s5 }
  0x56   : > { %s432_s25 = scalar_lea.vmem (!%p3700_p3), [#allocation2], %s2291_s2 }
  0x59   : > { %3556 = dma.done.wait (%p3761_p12), %s429_s29, 128  }
  0x5a   : > { %3558 = vsyncadd (%p3761_p12), %s429_s29, 4294967168  ;;  %s438_s15 = sand.u32 1, %s3695_s20   ;;  %s441_s11 = scalar_lea.vmem [#allocation5], %s3823_s5 }
  0x5b   : > { %s439_s21 = scalar_lea.sflag [#allocation6], %s438_s15 }
  0x5c   : > { %3560 = dma.done.wait (%p3761_p12), %s439_s21, 16  }
  0x5d   : > { %3562 = vsyncadd (%p3761_p12), %s439_s21, 4294967280 }
  0x5e   : > { %3564 = dma.done.wait (%p57_p1), [#allocation6], 128  }
  0x5f   : > { %3566 = vsyncadd (%p57_p1), [#allocation6], 4294967168 }
  0x60   : > { %3568 = dma.done.wait (%p57_p1), [#allocation9], 4096  }
  0x61   : > { %3570 = vsyncadd (%p57_p1), [#allocation9], 4294963200 }
  0x62   : > { %3572 = dma.done.wait (%p57_p1), [#allocation12], 8320  }
  0x63   : > { %3574 = vsyncadd (%p57_p1), [#allocation12], 4294958976 }
  0x64   : > { %3576 = dma.done.wait (%p57_p1), [#allocation15], 8192  }
  0x65   : > { %3578 = vsyncadd (%p57_p1), [#allocation15], 4294959104  ;;  %v3855_v0 = vld [vmem:[%s432_s25] sm:$0xff]  ;;  %v2388_v6 = vld [vmem:[#allocation8 + $0xb4] sm:$0xf0]  ;;  %v3615_v9 = vmov 128.0  }
  0x66   : > { %521 = vadd.xlane.f32.xlu0 %v3855_v0  ;;  %v531_v1 = vmul.f32 %v3855_v0, %v3855_v0  ;;  %v2386_v2 = vld [vmem:[#allocation8 + $0xa8] sm:$0xf]  ;;  %v2969_v3 = vld [vmem:[#allocation8 + $0xb0] sm:$0xf0]  ;;  %v2968_v4 = vld [vmem:[#allocation8 + $0xac] sm:$0xf]  ;;  %3232 = vrcp.f32 %v3615_v9 }
  0x67   : > { %v2387_v5 = vor.u32 %v2969_v3, %v2386_v2  ;;  %v2394_v7 = vld [vmem:[#allocation8 + $0xb0] sm:$0xf]  ;;  %v2970_v8 = vld [vmem:[#allocation8 + $0xb8] sm:$0xf0]  ;;  %v2391_v10 = vor.u32 %v2968_v4, %v2388_v6  ;;  %v2965_v14 = vld [vmem:[#allocation8 + $0x94] sm:$0xf] }
  0x68   : > { %v2395_v11 = vor.u32 %v2970_v8, %v2394_v7  ;;  %v2374_v12 = vld [vmem:[#allocation8 + $0x90] sm:$0xf]  ;;  %v2966_v13 = vld [vmem:[#allocation8 + $0x98] sm:$0xf0]  ;;  %v2376_v16 = vld [vmem:[#allocation8 + $0x9c] sm:$0xf0] }
  0x69   : > { %723 = vmatpush.bf16.msra.mxu0 %v2387_v5  ;;  %736 = vmatpush.bf16.msra.mxu1 %v2391_v10  ;;  %v2375_v15 = vor.u32 %v2966_v13, %v2374_v12  ;;  %v2382_v17 = vld [vmem:[#allocation8 + $0x98] sm:$0xf]  ;;  %v2967_v18 = vld [vmem:[#allocation8 + $0xa0] sm:$0xf0]  ;;  %v2379_v19 = vor.u32 %v2965_v14, %v2376_v16  ;;  %v2962_v24 = vld [vmem:[#allocation8 + $0x7c] sm:$0xf] }
  0x6a   : > { %749 = vmatpush.bf16.msra.mxu2 %v2395_v11  ;;  %v2383_v20 = vor.u32 %v2967_v18, %v2382_v17  ;;  %v2362_v22 = vld [vmem:[#allocation8 + $0x78] sm:$0xf]  ;;  %v2963_v23 = vld [vmem:[#allocation8 + $0x80] sm:$0xf0]  ;;  %v2364_v26 = vld [vmem:[#allocation8 + $0x84] sm:$0xf0] }
  0x6b   : > { %v2363_v25 = vor.u32 %v2963_v23, %v2362_v22  ;;  %v2370_v27 = vld [vmem:[#allocation8 + $0x80] sm:$0xf]  ;;  %v2964_v28 = vld [vmem:[#allocation8 + $0x88] sm:$0xf0]  ;;  %v2367_v29 = vor.u32 %v2962_v24, %v2364_v26  ;;  %v2959_v34 = vld [vmem:[#allocation8 + $0x64] sm:$0xf] }
  0x6c   : > { %v3860_v21 = vpop.eup %3232  ;;  %v2371_v30 = vor.u32 %v2964_v28, %v2370_v27  ;;  %v2350_v32 = vld [vmem:[#allocation8 + $0x60] sm:$0xf]  ;;  %v2960_v33 = vld [vmem:[#allocation8 + $0x68] sm:$0xf0]  ;;  %v2352_v36 = vld [vmem:[#allocation8 + $0x6c] sm:$0xf0] }
  0x6d   : > { %724 = vmatpush.bf16.msra.mxu0 %v2375_v15  ;;  %737 = vmatpush.bf16.msra.mxu1 %v2379_v19  ;;  %v524_v31 = vmul.f32 128.0, %v3860_v21  ;;  %v2351_v35 = vor.u32 %v2960_v33, %v2350_v32  ;;  %v2358_v37 = vld [vmem:[#allocation8 + $0x68] sm:$0xf]  ;;  %v2961_v38 = vld [vmem:[#allocation8 + $0x70] sm:$0xf0]  ;;  %v2355_v39 = vor.u32 %v2959_v34, %v2352_v36  ;;  %vm528_vm0 = vweird.f32 %v3860_v21  ;;  %s2299_s17 = sshll.u32 %s3823_s5, 2 }
  0x6e   : > { %532 = vadd.xlane.f32.xlu0 %v531_v1  ;;  %750 = vmatpush.bf16.msra.mxu2 %v2383_v20  ;;  %v2359_v40 = vor.u32 %v2961_v38, %v2358_v37  ;;  %v2338_v42 = vld [vmem:[#allocation8 + $0x48] sm:$0xf]  ;;  %v2957_v43 = vld [vmem:[#allocation8 + $0x50] sm:$0xf0]  ;;  %v2956_v44 = vld [vmem:[#allocation8 + $0x4c] sm:$0xf] }
  0x6f   : > { %v525_v41 = vsub.f32 1.0, %v524_v31  ;;  %v2339_v45 = vor.u32 %v2957_v43, %v2338_v42  ;;  %v2340_v46 = vld [vmem:[#allocation8 + $0x54] sm:$0xf0]  ;;  %v2346_v47 = vld [vmem:[#allocation8 + $0x50] sm:$0xf]  ;;  %vm798_vm4 = vcmask 1043456  }
  0x70   : > { %v2958_v48 = vld [vmem:[#allocation8 + $0x58] sm:$0xf0]  ;;  %v2343_v49 = vor.u32 %v2956_v44, %v2340_v46  ;;  %v2326_v52 = vld [vmem:[#allocation8 + $0x30] sm:$0xf]  ;;  %v2953_v54 = vld [vmem:[#allocation8 + $0x34] sm:$0xf] }
  0x71   : > { %725 = vmatpush.bf16.msra.mxu0 %v2363_v25  ;;  %738 = vmatpush.bf16.msra.mxu1 %v2367_v29  ;;  %v2347_v50 = vor.u32 %v2958_v48, %v2346_v47  ;;  %v526_v51 = vmul.f32 %v3860_v21, %v525_v41  ;;  %v2954_v53 = vld [vmem:[#allocation8 + $0x38] sm:$0xf0]  ;;  %v2328_v56 = vld [vmem:[#allocation8 + $0x3c] sm:$0xf0]  ;;  %v2334_v57 = vld [vmem:[#allocation8 + $0x38] sm:$0xf] }
  0x72   : > { %751 = vmatpush.bf16.msra.mxu2 %v2371_v30  ;;  %v2327_v55 = vor.u32 %v2954_v53, %v2326_v52  ;;  %v2955_v58 = vld [vmem:[#allocation8 + $0x40] sm:$0xf0]  ;;  %v2331_v59 = vor.u32 %v2953_v54, %v2328_v56  ;;  %v2314_v62 = vld [vmem:[#allocation8 + $0x18] sm:$0xf]  ;;  %v2950_v1 = vld [vmem:[#allocation8 + $0x1c] sm:$0xf] }
  0x73   : > { %v2335_v60 = vor.u32 %v2955_v58, %v2334_v57  ;;  %v527_v61 = vadd.f32 %v3860_v21, %v526_v51  ;;  %v2951_v63 = vld [vmem:[#allocation8 + $0x20] sm:$0xf0]  ;;  %v2316_v3 = vld [vmem:[#allocation8 + $0x24] sm:$0xf0]  ;;  %v2322_v4 = vld [vmem:[#allocation8 + $0x20] sm:$0xf] }
  0x74   : > { %v2315_v2 = vor.u32 %v2951_v63, %v2314_v62  ;;  %v2952_v5 = vld [vmem:[#allocation8 + $0x28] sm:$0xf0]  ;;  %v2319_v7 = vor.u32 %v2950_v1, %v2316_v3  ;;  %v2302_v9 = vld [vmem:[#allocation8] sm:$0xf]  ;;  %v2947_v11 = vld [vmem:[#allocation8 + $0x4] sm:$0xf] }
  0x75   : > { %726 = vmatpush.bf16.msra.mxu0 %v2351_v35  ;;  %739 = vmatpush.bf16.msra.mxu1 %v2355_v39  ;;  %v2323_v8 = vor.u32 %v2952_v5, %v2322_v4  ;;  %v2948_v10 = vld [vmem:[#allocation8 + $0x8] sm:$0xf0]  ;;  %v2304_v12 = vld [vmem:[#allocation8 + $0xc] sm:$0xf0]  ;;  %v2310_v13 = vld [vmem:[#allocation8 + $0x8] sm:$0xf]  ;;  %v3869_v15 = vsel %vm528_vm0, %v3860_v21, %v527_v61 }
  0x76   : > { %752 = vmatpush.bf16.msra.mxu2 %v2359_v40  ;;  %v2949_v14 = vld [vmem:[#allocation8 + $0x10] sm:$0xf0]  ;;  %v2303_v16 = vor.u32 %v2948_v10, %v2302_v9  ;;  %v2307_v17 = vor.u32 %v2947_v11, %v2304_v12  ;;  %v3873_v30 = vld [vmem:[#allocation7] sm:$0x3f]  ;;  %v587_v40 = vld [vmem:[%s3963_s4] sm:$0x7] }
  0x77   : > { %v2311_v18 = vor.u32 %v2949_v14, %v2310_v13  ;;  %v550_v33 = vperm.slane %v3873_v30, 0  ;;  %v552_v36 = vperm.slane %v3873_v30, 1  ;;  %v590_v41 = vperm.slane %v587_v40, 1  ;;  %v3231_v57 = vld [vmem:[%s441_s11] ss:$0 sm:$0xff]  ;;  %v2978_v4 = vld [vmem:[#allocation10 + $0x38] sm:$0xff] }
  0x78   : > { %v591_v47 = vperm.slane %v587_v40, 2  ;;  %vm781_vm5 = vcmask 64512   ;;  %v2977_v5 = vld [vmem:[#allocation10 + $0x30] sm:$0xff]  ;;  %v2972_v11 = vld [vmem:[#allocation10 + $0x8] sm:$0xff]  ;;  %vm2063_vm6 = vcmask 60416   ;;  %s3887_s12 = scalar_lea.vmem [#allocation17], %s2299_s17 }
  0x79   : > { %727 = vmatpush.bf16.msra.mxu0 %v2339_v45  ;;  %740 = vmatpush.bf16.msra.mxu1 %v2343_v49  ;;  %v589_v45 = vperm.slane %v587_v40, 0  ;;  %v2973_v9 = vld [vmem:[#allocation10 + $0x10] sm:$0xff]  ;;  %v3031_v40 = vld [vmem:[#allocation11 + $0x19c] sm:$0xf0]  ;;  %s2944_s7 = sshll.u32 %s3695_s20, 2  ;;  %s2097_s6 = sshll.u32 %s3887_s12, 4  ;;  %s2098_s6 = int_to_ptr.vmem [resolvable:$true] %s2097_s6 }
  0x7a   : > { %753 = vmatpush.bf16.msra.mxu2 %v2347_v50  ;;  %s2095_s22 = scalar_lea.hbm %s3969_s10, %s2944_s7  ;;  %s2071_s26 = scalar_lea.sflag [#allocation18], %s3823_s5 }
  0x7b   : > { %s2099_s19 = sshll.u32 %s2095_s22, 4  ;;  %s3503_s21 = scalar_lea.hbm %s3969_s10, 8  ;;  %s2100_s19 = int_to_ptr.hbm [resolvable:$true] %s2099_s19 }
  0x7c   : > { %s3497_s24 = sshra.s32 %s2100_s19, 4  ;;  %s3498_s24 = int_to_ptr.hbm [resolvable:$true] %s3497_s24 }
  0x7d   : > { %728 = vmatpush.bf16.msra.mxu0 %v2327_v55  ;;  %741 = vmatpush.bf16.msra.mxu1 %v2331_v59  ;;  %s3499_s29 = scalar_lea.hbm %s3498_s24, 4  ;;  %p3504_p7 = scmp.lt.s32.totalorder %s3498_s24, %s3969_s10 }
  0x7e   : > { %754 = vmatpush.bf16.msra.mxu2 %v2335_v60  ;;  %p3500_p1 = scmp.ne.s32.totalorder %s3498_s24, %s3499_s29  ;;  %p3505_p9 = scmp.lt.s32.totalorder %s3503_s21, %s3499_s29 }
  0x80   : > { %p3501_p3 = pnand %p3500_p1, %p3770_p5  ;;  %p3506_p4 = por %p3505_p9, %p3504_p7 }
  0x81   : > { %729 = vmatpush.bf16.msra.mxu0 %v2315_v2  ;;  %742 = vmatpush.bf16.msra.mxu1 %v2319_v7  ;;  %v2975_v7 = vld [vmem:[#allocation10 + $0x20] sm:$0xff] }
  0x82   : > { %755 = vmatpush.bf16.msra.mxu2 %v2323_v8  ;;  %v2974_v8 = vld [vmem:[#allocation10 + $0x18] sm:$0xff]  ;;  %p3502_p12 = pneg %p3501_p3 }
  0x84   : > { %p3507_p8 = pnand %p3506_p4, %p3502_p12 }
  0x85   : > { %730 = vmatpush.bf16.msra.mxu0 %v2303_v16  ;;  %743 = vmatpush.bf16.msra.mxu1 %v2307_v17  ;;  %v2971_v16 = vld [vmem:[#allocation10] sm:$0xff] }
  0x86   : > { %756 = vmatpush.bf16.msra.mxu2 %v2311_v18 }
  0xd9   : > { %v522_v6 = vpop.xlane.xlu0 %521 }
  0xda   : > { %v530_v19 = vmul.f32 %v3869_v15, %v522_v6  ;;  %v2976_v6 = vld [vmem:[#allocation10 + $0x28] sm:$0xff] }
  0xdc   : > { %v535_v22 = vmul.f32 %v530_v19, %v530_v19  ;;  %v537_v32 = vsub.f32 %v3855_v0, %v530_v19 }
  0xe1   : > { %v533_v20 = vpop.xlane.xlu0 %532 }
  0xe2   : > { %v534_v23 = vmul.f32 %v533_v20, %v3869_v15  ;;  %v2655_v20 = vld [vmem:[#allocation11 + $0x1c0] sm:$0xf] }
  0xe4   : > { %v536_v24 = vsub.f32 %v534_v23, %v535_v22  ;;  %v3039_v22 = vld [vmem:[#allocation11 + $0x1dc] sm:$0xf0]  ;;  %v3035_v23 = vld [vmem:[#allocation11 + $0x1c4] sm:$0xf] }
  0xe6   : > { %v538_v25 = vadd.f32 1e-05, %v536_v24  ;;  %v2656_v24 = vor.u32 %v3039_v22, %v2655_v20  ;;  %v3004_v22 = vld [vmem:[#allocation11 + $0xcc] sm:$0xf] }
  0xe8   : > { %3234 = vrsqrt.f32 %v538_v25  ;;  %vm545_vm2 = vweird.f32 %v538_v25 }
  0xee   : > { %v3235_v21 = vpop.eup %3234 }
  0xef   : > { %v540_v26 = vmul.f32 %v3235_v21, %v538_v25  ;;  %vm546_vm1 = vweird.f32 %v3235_v21  ;;  %v2657_v25 = vld [vmem:[#allocation11 + $0x1e0] sm:$0xf0] }
  0xf0   : > { %vm547_vm3 = vmor %vm545_vm2, %vm546_vm1 }
  0xf1   : > { %v541_v27 = vmul.f32 %v3235_v21, %v540_v26  ;;  %v3040_v26 = vld [vmem:[#allocation11 + $0x1e4] sm:$0xf0] }
  0xf3   : > { %v542_v28 = vmul.f32 0.5, %v541_v27  ;;  %v2660_v27 = vor.u32 %v3035_v23, %v2657_v25  ;;  %v2537_v23 = vld [vmem:[#allocation11 + $0xe8] sm:$0xf0]  ;;  %v2495_v25 = vld [vmem:[#allocation11 + $0x80] sm:$0xf] }
  0xf5   : > { %v543_v29 = vsub.f32 1.5, %v542_v28  ;;  %1337 = vmatpush.bf16.msrb.mxu1 %v2660_v27 }
  0xf7   : > { %v544_v31 = vmul.f32 %v3235_v21, %v543_v29  ;;  %v3036_v29 = vld [vmem:[#allocation11 + $0x1cc] sm:$0xf] }
  0xf9   : > { %v548_v34 = vsel %vm547_vm3, %v3235_v21, %v544_v31  ;;  %v2663_v21 = vld [vmem:[#allocation11 + $0x1c8] sm:$0xf]  ;;  %v2665_v31 = vld [vmem:[#allocation11 + $0x1e8] sm:$0xf0] }
  0xfa   : > { %v549_v35 = vmul.f32 %v548_v34, %v537_v32  ;;  %v2664_v28 = vor.u32 %v3040_v26, %v2663_v21  ;;  %v2668_v32 = vor.u32 %v3036_v29, %v2665_v31  ;;  %v2999_v21 = vld [vmem:[#allocation11 + $0x9c] sm:$0xf0]  ;;  %v2995_v26 = vld [vmem:[#allocation11 + $0x84] sm:$0xf]  ;;  %v2503_v29 = vld [vmem:[#allocation11 + $0x88] sm:$0xf] }
  0xfb   : > { %v2496_v27 = vor.u32 %v2999_v21, %v2495_v25  ;;  %v3000_v31 = vld [vmem:[#allocation11 + $0xa4] sm:$0xf0]  ;;  %v2607_v25 = vld [vmem:[#allocation11 + $0x150] sm:$0xf] }
  0xfc   : > { %v551_v37 = vmul.f32 %v550_v33, %v549_v35  ;;  %1350 = vmatpush.bf16.msrb.mxu2 %v2664_v28  ;;  %v832_v33 = vperm.slane %v3873_v30, 4  ;;  %v2497_v28 = vld [vmem:[#allocation11 + $0xa0] sm:$0xf0]  ;;  %v3025_v21 = vld [vmem:[#allocation11 + $0x16c] sm:$0xf0] }
  0xfe   : > { %v553_v38 = vadd.f32 %v552_v36, %v551_v37 }
 0x100   : > { %v554_v39 = vpack.c.bf16 %v553_v38, %v553_v38 }
 0x102   : > { %731 = vmatmul.bf16.vlgmr.msra.gmra.mxu0 %v554_v39  ;;  %744 = vmatmul.bf16.vlgmr.msra.gmra.mxu1 %v554_v39 }
 0x103   : > { %757 = vmatmul.bf16.vlgmr.msra.gmra.mxu2 %v554_v39  ;;  %v2623_v39 = vld [vmem:[#allocation11 + $0x180] sm:$0xf] }
 0x17f   : > { %v732_v42 = vpop.f32.mrf.mxu0  ;;  %v745_v43 = vpop.f32.mrf.mxu1 }
 0x180   : > { %v746_v44 = vadd.f32 %v745_v43, %v590_v41  ;;  %v733_v48 = vadd.f32 %v732_v42, %v589_v45  ;;  %v3027_v41 = vld [vmem:[#allocation11 + $0x184] sm:$0xf]  ;;  %v2624_v42 = vor.u32 %v3031_v40, %v2623_v39  ;;  %v3032_v45 = vld [vmem:[#allocation11 + $0x1a4] sm:$0xf0]  ;;  %v2991_v39 = vld [vmem:[#allocation11 + $0x5c] sm:$0xf0] }
 0x181   : > { %v2625_v43 = vld [vmem:[#allocation11 + $0x1a0] sm:$0xf0] }
 0x182   : > { %v763_v46 = vpack.c.bf16 %v746_v44, %v746_v44  ;;  %v762_v53 = vpack.c.bf16 %v733_v48, %v733_v48  ;;  %v2631_v44 = vld [vmem:[#allocation11 + $0x188] sm:$0xf]  ;;  %v3028_v48 = vld [vmem:[#allocation11 + $0x18c] sm:$0xf]  ;;  %v2987_v40 = vld [vmem:[#allocation11 + $0x44] sm:$0xf] }
 0x184   : > { %775 = vmatpush.bf16.xpose.msrb.mxu0 %v763_v46  ;;  %v2628_v46 = vor.u32 %v3027_v41, %v2625_v43  ;;  %v2471_v43 = vld [vmem:[#allocation11 + $0x48] sm:$0xf] }
 0x186   : > { %v758_v49 = vpop.f32.mrf.mxu2  ;;  %1338 = vmatpush.bf16.msrb.mxu1 %v2628_v46 }
 0x187   : > { %v759_v50 = vadd.f32 %v758_v49, %v591_v47  ;;  %v734_v51 = vpop.f32.mrf.mxu0  ;;  %v747_v52 = vpop.f32.mrf.mxu1  ;;  %v2632_v47 = vor.u32 %v3032_v45, %v2631_v44  ;;  %v2633_v49 = vld [vmem:[#allocation11 + $0x1a8] sm:$0xf0]  ;;  %v2992_v44 = vld [vmem:[#allocation11 + $0x64] sm:$0xf0] }
 0x188   : > { %v3023_v51 = vld [vmem:[#allocation11 + $0x15c] sm:$0xf0]  ;;  %v3019_v52 = vld [vmem:[#allocation11 + $0x144] sm:$0xf]  ;;  %v2472_v46 = vor.u32 %v2992_v44, %v2471_v43  ;;  %v2577_v43 = vld [vmem:[#allocation11 + $0x130] sm:$0xf0] }
 0x189   : > { %v794_v54 = vpack.c.bf16 %v759_v50, %v759_v50  ;;  %1351 = vmatpush.bf16.msrb.mxu2 %v2632_v47  ;;  %v2591_v50 = vld [vmem:[#allocation11 + $0x140] sm:$0xf]  ;;  %v2988_v47 = vld [vmem:[#allocation11 + $0x4c] sm:$0xf]  ;;  %v2583_v44 = vld [vmem:[#allocation11 + $0x118] sm:$0xf] }
 0x18b   : > { %776 = vmatmul.bf16.vlgmr.msrb.gmra.mxu0 %v762_v53  ;;  %v800_v55 = vsel %vm798_vm4, %v794_v54, 0  ;;  %v2592_v53 = vor.u32 %v3023_v51, %v2591_v50  ;;  %v2593_v54 = vld [vmem:[#allocation11 + $0x160] sm:$0xf0]  ;;  %v2983_v50 = vld [vmem:[#allocation11 + $0x1c] sm:$0xf0] }
 0x18c   : > { %809 = vmatpush.bf16.msra.mxu3 %v800_v55  ;;  %1324 = vmatpush.bf16.msra.mxu0 %v2656_v24  ;;  %v2599_v55 = vld [vmem:[#allocation11 + $0x148] sm:$0xf]  ;;  %v2540_v24 = vor.u32 %v3004_v22, %v2537_v23  ;;  %v2979_v51 = vld [vmem:[#allocation11 + $0x4] sm:$0xf] }
 0x18e   : > { %v760_v56 = vpop.f32.mrf.mxu2 }
 0x18f   : > { %v3024_v56 = vld [vmem:[#allocation11 + $0x164] sm:$0xf0] }
 0x190   : > { %881 = vmatpush.bf16.msrb.mxu3 %v2978_v4  ;;  %1325 = vmatpush.bf16.msra.mxu0 %v2624_v42  ;;  %v2567_v4 = vld [vmem:[#allocation11 + $0x108] sm:$0xf]  ;;  %v2465_v42 = vld [vmem:[#allocation11 + $0x60] sm:$0xf0] }
 0x191   : > { %v2468_v45 = vor.u32 %v2987_v40, %v2465_v42  ;;  %v3013_v40 = vld [vmem:[#allocation11 + $0x114] sm:$0xf] }
 0x194   : > { %882 = vmatpush.bf16.msrb.mxu3 %v2977_v5  ;;  %1326 = vmatpush.bf16.msra.mxu0 %v2592_v53  ;;  %v3016_v5 = vld [vmem:[#allocation11 + $0x124] sm:$0xf0]  ;;  %v2433_v53 = vld [vmem:[#allocation11 + $0x20] sm:$0xf0] }
 0x198   : > { %883 = vmatpush.bf16.msrb.mxu3 %v2976_v6 }
 0x19c   : > { %884 = vmatpush.bf16.msrb.mxu3 %v2975_v7  ;;  %v2568_v7 = vor.u32 %v3016_v5, %v2567_v4  ;;  %v2679_v4 = vld [vmem:[#allocation11 + $0x1d8] sm:$0xf] }
 0x19d   : > { %v3042_v5 = vld [vmem:[#allocation11 + $0x1f4] sm:$0xf0] }
 0x1a0   : > { %885 = vmatpush.bf16.msrb.mxu3 %v2974_v8  ;;  %v3012_v8 = vld [vmem:[#allocation11 + $0x10c] sm:$0xf] }
 0x1a4   : > { %886 = vmatpush.bf16.msrb.mxu3 %v2973_v9  ;;  %v2569_v9 = vld [vmem:[#allocation11 + $0x128] sm:$0xf0] }
 0x1a8   : > { %887 = vmatpush.bf16.msrb.mxu3 %v2972_v11  ;;  %v2527_v11 = vld [vmem:[#allocation11 + $0xc0] sm:$0xf] }
 0x1ac   : > { %888 = vmatpush.bf16.msrb.mxu3 %v2971_v16  ;;  %v2529_v16 = vld [vmem:[#allocation11 + $0xe0] sm:$0xf0] }
 0x208   : > { %v777_v58 = vpop.f32.mrf.mxu0 }
 0x209   : > { %v778_v59 = vadd.f32 %v3231_v57, %v777_v58  ;;  %v2596_v57 = vor.u32 %v3019_v52, %v2593_v54  ;;  %v2600_v58 = vor.u32 %v3024_v56, %v2599_v55  ;;  %v2439_v54 = vld [vmem:[#allocation11 + $0x8] sm:$0xf]  ;;  %v2436_v56 = vor.u32 %v2979_v51, %v2433_v53  ;;  %v2543_v51 = vld [vmem:[#allocation11 + $0xd0] sm:$0xf]  ;;  %v3005_v53 = vld [vmem:[#allocation11 + $0xd4] sm:$0xf] }
 0x20a   : > { %v2984_v55 = vld [vmem:[#allocation11 + $0x24] sm:$0xf0] }
 0x20b   : > { %v782_v60 = vsel %vm781_vm5, %v778_v59, -inf  ;;  %1339 = vmatpush.bf16.msrb.mxu1 %v2596_v57  ;;  %1352 = vmatpush.bf16.msrb.mxu2 %v2600_v58  ;;  %v2440_v57 = vor.u32 %v2984_v55, %v2439_v54  ;;  %v2980_v58 = vld [vmem:[#allocation11 + $0xc] sm:$0xf] }
 0x20c   : > { %783 = vmax.xlane.f32.xlu1 %v782_v60  ;;  %v2601_v60 = vld [vmem:[#allocation11 + $0x168] sm:$0xf0] }
 0x20f   : > { %1353 = vmatpush.bf16.msrb.mxu2 %v2568_v7  ;;  %v2680_v7 = vor.u32 %v3042_v5, %v2679_v4  ;;  %v3001_v4 = vld [vmem:[#allocation11 + $0xac] sm:$0xf0]  ;;  %v2997_v5 = vld [vmem:[#allocation11 + $0x94] sm:$0xf] }
 0x210   : > { %v779_v61 = vpop.f32.mrf.mxu0 }
 0x27f   : > { %v784_v62 = vpop.xlane.xlu1 %783 }
 0x280   : > { %v785_v63 = vsub.f32 %v778_v59, %v784_v62  ;;  %v3020_v59 = vld [vmem:[#allocation11 + $0x14c] sm:$0xf]  ;;  %v2559_v62 = vld [vmem:[#allocation11 + $0x100] sm:$0xf] }
 0x281   : > { %v2604_v61 = vor.u32 %v3020_v59, %v2601_v60  ;;  %v2441_v59 = vld [vmem:[#allocation11 + $0x28] sm:$0xf0]  ;;  %v2671_v60 = vld [vmem:[#allocation11 + $0x1d0] sm:$0xf] }
 0x282   : > { %v786_v1 = vmul.f32 1.442695, %v785_v63  ;;  %v3015_v63 = vld [vmem:[#allocation11 + $0x11c] sm:$0xf0] }
 0x284   : > { %3236 = vpow2.f32 %v786_v1  ;;  %v3011_v1 = vld [vmem:[#allocation11 + $0x104] sm:$0xf] }
 0x28a   : > { %v3237_v2 = vpop.eup %3236 }
 0x28b   : > { %v788_v3 = vsel %vm781_vm5, %v3237_v2, 0.0 }
 0x28c   : > { %789 = vadd.xlane.f32.xlu1 %v788_v3  ;;  %v2561_v3 = vld [vmem:[#allocation11 + $0x120] sm:$0xf0] }
 0x28d   : > { %v2564_v6 = vor.u32 %v3011_v1, %v2561_v3  ;;  %v2673_v1 = vld [vmem:[#allocation11 + $0x1f0] sm:$0xf0] }
 0x28f   : > { %1340 = vmatpush.bf16.msrb.mxu1 %v2564_v6  ;;  %v3038_v6 = vld [vmem:[#allocation11 + $0x1dc] sm:$0xf] }
 0x2ff   : > { %v790_v10 = vpop.xlane.xlu1 %789 }
 0x300   : > { %3238 = vrcp.f32 %v790_v10  ;;  %v2572_v10 = vor.u32 %v3012_v8, %v2569_v9  ;;  %v2681_v8 = vld [vmem:[#allocation11 + $0x1f8] sm:$0xf0]  ;;  %v2639_v9 = vld [vmem:[#allocation11 + $0x190] sm:$0xf] }
 0x306   : > { %v3239_v12 = vpop.eup %3238 }
 0x307   : > { %v792_v13 = vmul.f32 %v3239_v12, %v3237_v2  ;;  %v2560_v2 = vor.u32 %v3015_v63, %v2559_v62  ;;  %v3007_v12 = vld [vmem:[#allocation11 + $0xdc] sm:$0xf0]  ;;  %v3041_v62 = vld [vmem:[#allocation11 + $0x1ec] sm:$0xf0]  ;;  %v3037_v63 = vld [vmem:[#allocation11 + $0x1d4] sm:$0xf] }
 0x308   : > { %v2676_v3 = vor.u32 %v3037_v63, %v2673_v1  ;;  %v2553_v63 = vld [vmem:[#allocation11 + $0xf8] sm:$0xf0]  ;;  %v2511_v1 = vld [vmem:[#allocation11 + $0x90] sm:$0xf] }
 0x309   : > { %v793_v14 = vpack.c.bf16 %v792_v13, %v792_v13  ;;  %1327 = vmatpush.bf16.msra.mxu0 %v2560_v2  ;;  %v3003_v13 = vld [vmem:[#allocation11 + $0xc4] sm:$0xf]  ;;  %v2672_v2 = vor.u32 %v3041_v62, %v2671_v60  ;;  %v3006_v62 = vld [vmem:[#allocation11 + $0xdc] sm:$0xf] }
 0x30b   : > { %2396 = vmatmul.msk.bf16.vlgmr.msra.gmra.mxu3 %vm781_vm5, %v793_v14  ;;  %2064 = vst.msk [vmem:[%s3887_s12] sm:$0xf] %vm2063_vm6, %v793_v14  ;;  %v2528_v14 = vor.u32 %v3007_v12, %v2527_v11  ;;  %v2684_v11 = vor.u32 %v3038_v6, %v2681_v8  ;;  %v2513_v6 = vld [vmem:[#allocation11 + $0xb0] sm:$0xf0]  ;;  %v2998_v8 = vld [vmem:[#allocation11 + $0x9c] sm:$0xf] }
 0x30c   : > { %1363 = vmatpush.bf16.msra.mxu3 %v2668_v32  ;;  %v2500_v32 = vor.u32 %v2995_v26, %v2497_v28  ;;  %v3021_v26 = vld [vmem:[#allocation11 + $0x154] sm:$0xf] }
 0x30d   : > { %1328 = vmatpush.bf16.msra.mxu0 %v2528_v14  ;;  %v2641_v14 = vld [vmem:[#allocation11 + $0x1b0] sm:$0xf0] }
 0x30e   : > { %v2609_v28 = vld [vmem:[#allocation11 + $0x170] sm:$0xf0] }
 0x311   : > { %1329 = vmatpush.bf16.msra.mxu0 %v2496_v27  ;;  %v2608_v27 = vor.u32 %v3025_v21, %v2607_v25 }
 0x38e   : > { %v811_v17 = vpop.f32.mrf.mxu3 }
 0x38f   : > { %v815_v18 = vpack.c.bf16 %v811_v17, %v811_v17  ;;  %v2535_v17 = vld [vmem:[#allocation11 + $0xc8] sm:$0xf] }
 0x391   : > { %889 = vmatmul.bf16.vlgmr.msrb.gmra.mxu3 %v815_v18  ;;  %v3008_v18 = vld [vmem:[#allocation11 + $0xe4] sm:$0xf0] }
 0x392   : > { %v2536_v20 = vor.u32 %v3008_v18, %v2535_v17  ;;  %v3034_v18 = vld [vmem:[#allocation11 + $0x1b4] sm:$0xf0] }
 0x394   : > { %1354 = vmatpush.bf16.msrb.mxu2 %v2536_v20  ;;  %v2649_v20 = vld [vmem:[#allocation11 + $0x1b8] sm:$0xf0] }
 0x396   : > { %v813_v19 = vpop.f32.mrf.mxu3 }
 0x397   : > { %v2532_v19 = vor.u32 %v3003_v13, %v2529_v16  ;;  %v3029_v13 = vld [vmem:[#allocation11 + $0x194] sm:$0xf]  ;;  %v2647_v16 = vld [vmem:[#allocation11 + $0x198] sm:$0xf] }
 0x398   : > { %v2644_v17 = vor.u32 %v3029_v13, %v2641_v14  ;;  %v2648_v22 = vor.u32 %v3034_v18, %v2647_v16  ;;  %v2479_v13 = vld [vmem:[#allocation11 + $0x50] sm:$0xf]  ;;  %v2481_v18 = vld [vmem:[#allocation11 + $0x70] sm:$0xf0] }
 0x399   : > { %1341 = vmatpush.bf16.msrb.mxu1 %v2532_v19  ;;  %v3030_v19 = vld [vmem:[#allocation11 + $0x19c] sm:$0xf]  ;;  %v2993_v16 = vld [vmem:[#allocation11 + $0x6c] sm:$0xf0] }
 0x39a   : > { %v2652_v23 = vor.u32 %v3030_v19, %v2649_v20  ;;  %v2487_v20 = vld [vmem:[#allocation11 + $0x58] sm:$0xf]  ;;  %v2480_v25 = vor.u32 %v2993_v16, %v2479_v13  ;;  %v3052_v16 = vld [vmem:[#allocation14 + $0x48] sm:$0xff] }
 0x39b   : > { %v3069_v13 = vld [vmem:[#allocation14 + $0xd0] sm:$0xff] }
 0x39d   : > { %1342 = vmatpush.bf16.msrb.mxu1 %v2500_v32  ;;  %v2612_v32 = vor.u32 %v3021_v26, %v2609_v28  ;;  %v2447_v26 = vld [vmem:[#allocation11 + $0x10] sm:$0xf] }
 0x39e   : > { %v2985_v28 = vld [vmem:[#allocation11 + $0x2c] sm:$0xf0] }
 0x3a1   : > { %1343 = vmatpush.bf16.msrb.mxu1 %v2468_v45  ;;  %v3018_v45 = vld [vmem:[#allocation11 + $0x134] sm:$0xf0] }
 0x3a5   : > { %1344 = vmatpush.bf16.msrb.mxu1 %v2436_v56 }
 0x3a9   : > { %1389 = vmatpush.bf16.msra.mxu1 %v2676_v3  ;;  %v2556_v3 = vor.u32 %v3006_v62, %v2553_v63  ;;  %v3048_v62 = vld [vmem:[#allocation14 + $0x28] sm:$0xff] }
 0x3aa   : > { %v3056_v63 = vld [vmem:[#allocation14 + $0x68] sm:$0xff] }
 0x3ad   : > { %1390 = vmatpush.bf16.msra.mxu1 %v2644_v17  ;;  %v2989_v17 = vld [vmem:[#allocation11 + $0x54] sm:$0xf] }
 0x3ae   : > { %v2484_v21 = vor.u32 %v2989_v17, %v2481_v18  ;;  %v3060_v17 = vld [vmem:[#allocation14 + $0x88] sm:$0xff] }
 0x3af   : > { %v3068_v18 = vld [vmem:[#allocation14 + $0xc8] sm:$0xff] }
 0x3b1   : > { %1391 = vmatpush.bf16.msra.mxu1 %v2612_v32 }
 0x414   : > { %v890_v34 = vpop.f32.mrf.mxu3 }
 0x415   : > { %v891_v35 = vadd.f32 %v890_v34, %v832_v33  ;;  %v2504_v33 = vor.u32 %v3000_v31, %v2503_v29  ;;  %v2996_v34 = vld [vmem:[#allocation11 + $0x8c] sm:$0xf]  ;;  %v2615_v29 = vld [vmem:[#allocation11 + $0x158] sm:$0xf] }
 0x416   : > { %v3026_v31 = vld [vmem:[#allocation11 + $0x174] sm:$0xf0] }
 0x417   : > { %v3892_v36 = vadd.f32 %v891_v35, %v3855_v0  ;;  %v2636_v0 = vor.u32 %v3028_v48, %v2633_v49  ;;  %v2505_v35 = vld [vmem:[#allocation11 + $0xa8] sm:$0xf0]  ;;  %1355 = vmatpush.bf16.msrb.mxu2 %v2504_v33  ;;  %v2616_v33 = vor.u32 %v3026_v31, %v2615_v29  ;;  %v2981_v29 = vld [vmem:[#allocation11 + $0x14] sm:$0xf] }
 0x418   : > { %v2473_v48 = vld [vmem:[#allocation11 + $0x68] sm:$0xf0]  ;;  %v2449_v31 = vld [vmem:[#allocation11 + $0x30] sm:$0xf0] }
 0x419   : > { %895 = vadd.xlane.f32.xlu2 %v3892_v36  ;;  %v898_v38 = vmul.f32 %v3892_v36, %v3892_v36  ;;  %1364 = vmatpush.bf16.msra.mxu3 %v2636_v0  ;;  %v2476_v49 = vor.u32 %v2988_v47, %v2473_v48  ;;  %v2431_v0 = vld [vmem:[#allocation11] sm:$0xf]  ;;  %v2584_v47 = vor.u32 %v3018_v45, %v2583_v44  ;;  %v3014_v48 = vld [vmem:[#allocation11 + $0x11c] sm:$0xf] }
 0x41a   : > { %v2432_v52 = vor.u32 %v2983_v50, %v2431_v0 }
 0x41b   : > { %1356 = vmatpush.bf16.msrb.mxu2 %v2472_v46  ;;  %v2580_v46 = vor.u32 %v3013_v40, %v2577_v43  ;;  %v2452_v40 = vor.u32 %v2981_v29, %v2449_v31  ;;  %v3080_v29 = vld [vmem:[#allocation14 + $0x128] sm:$0xff] }
 0x41c   : > { %v892_v37 = vpop.f32.mrf.mxu3  ;;  %v3088_v31 = vld [vmem:[#allocation14 + $0x168] sm:$0xff] }
 0x41d   : > { %1365 = vmatpush.bf16.msra.mxu3 %v2604_v61  ;;  %v2508_v37 = vor.u32 %v2996_v34, %v2505_v35  ;;  %v2444_v61 = vor.u32 %v2980_v58, %v2441_v59  ;;  %v3022_v34 = vld [vmem:[#allocation11 + $0x15c] sm:$0xf]  ;;  %1392 = vmatpush.bf16.msra.mxu1 %v2580_v46  ;;  %v2551_v58 = vld [vmem:[#allocation11 + $0xd8] sm:$0xf] }
 0x41e   : > { %v2617_v35 = vld [vmem:[#allocation11 + $0x178] sm:$0xf0]  ;;  %v3010_v59 = vld [vmem:[#allocation11 + $0xf4] sm:$0xf0] }
 0x41f   : > { %1357 = vmatpush.bf16.msrb.mxu2 %v2440_v57  ;;  %v2545_v57 = vld [vmem:[#allocation11 + $0xf0] sm:$0xf0] }
 0x420   : > { %v2548_v60 = vor.u32 %v3005_v53, %v2545_v57  ;;  %v3058_v57 = vld [vmem:[#allocation14 + $0x78] sm:$0xff] }
 0x421   : > { %899 = vadd.xlane.f32.xlu2 %v898_v38  ;;  %1366 = vmatpush.bf16.msra.mxu3 %v2572_v10  ;;  %v2463_v38 = vld [vmem:[#allocation11 + $0x40] sm:$0xf]  ;;  %v3033_v10 = vld [vmem:[#allocation11 + $0x1ac] sm:$0xf0] }
 0x422   : > { %v2464_v41 = vor.u32 %v2991_v39, %v2463_v38  ;;  %v2640_v12 = vor.u32 %v3033_v10, %v2639_v9  ;;  %v2575_v38 = vld [vmem:[#allocation11 + $0x110] sm:$0xf]  ;;  %1393 = vmatpush.bf16.msra.mxu1 %v2548_v60  ;;  %v2512_v10 = vor.u32 %v3001_v4, %v2511_v1  ;;  %v3057_v60 = vld [vmem:[#allocation14 + $0x70] sm:$0xff]  ;;  %v3055_v4 = vld [vmem:[#allocation14 + $0x60] sm:$0xff] }
 0x423   : > { %1402 = vmatpush.bf16.msra.mxu2 %v2680_v7  ;;  %v3017_v39 = vld [vmem:[#allocation11 + $0x12c] sm:$0xf0]  ;;  %v2519_v7 = vld [vmem:[#allocation11 + $0x98] sm:$0xf] }
 0x424   : > { %1330 = vmatpush.bf16.msra.mxu0 %v2464_v41  ;;  %v2576_v42 = vor.u32 %v3017_v39, %v2575_v38  ;;  %v2448_v39 = vor.u32 %v2985_v28, %v2447_v26  ;;  %v3064_v1 = vld [vmem:[#allocation14 + $0xa8] sm:$0xff]  ;;  %v3106_v26 = vld [vmem:[#allocation14 + $0x1f8] sm:$0xff]  ;;  %v3089_v28 = vld [vmem:[#allocation14 + $0x170] sm:$0xff] }
 0x425   : > { %1367 = vmatpush.bf16.msra.mxu3 %v2540_v24 }
 0x427   : > { %1403 = vmatpush.bf16.msra.mxu2 %v2648_v22  ;;  %v2994_v22 = vld [vmem:[#allocation11 + $0x74] sm:$0xf0] }
 0x428   : > { %1331 = vmatpush.bf16.msra.mxu0 %v2432_v52  ;;  %v3009_v52 = vld [vmem:[#allocation11 + $0xec] sm:$0xf0] }
 0x429   : > { %1368 = vmatpush.bf16.msra.mxu3 %v2508_v37  ;;  %v2620_v37 = vor.u32 %v3022_v34, %v2617_v35  ;;  %v2544_v56 = vor.u32 %v3009_v52, %v2543_v51  ;;  %v2986_v34 = vld [vmem:[#allocation11 + $0x34] sm:$0xf0]  ;;  %v2982_v35 = vld [vmem:[#allocation11 + $0x1c] sm:$0xf]  ;;  %v919_v51 = vperm.slane %v3873_v30, 3 }
 0x42b   : > { %1404 = vmatpush.bf16.msra.mxu2 %v2616_v33  ;;  %v2455_v33 = vld [vmem:[#allocation11 + $0x18] sm:$0xf] }
 0x42c   : > { %1376 = vmatpush.bf16.msrb.mxu0 %v2672_v2  ;;  %v2456_v43 = vor.u32 %v2986_v34, %v2455_v33  ;;  %v3105_v33 = vld [vmem:[#allocation14 + $0x1f0] sm:$0xff]  ;;  %v3079_v34 = vld [vmem:[#allocation14 + $0x120] sm:$0xff] }
 0x42d   : > { %1369 = vmatpush.bf16.msra.mxu3 %v2476_v49  ;;  %v2585_v49 = vld [vmem:[#allocation11 + $0x138] sm:$0xf0] }
 0x42e   : > { %v2588_v0 = vor.u32 %v3014_v48, %v2585_v49 }
 0x42f   : > { %1405 = vmatpush.bf16.msra.mxu2 %v2584_v47 }
 0x430   : > { %1377 = vmatpush.bf16.msrb.mxu0 %v2640_v12  ;;  %v2521_v12 = vld [vmem:[#allocation11 + $0xb8] sm:$0xf0] }
 0x431   : > { %1370 = vmatpush.bf16.msra.mxu3 %v2444_v61  ;;  %v2552_v61 = vor.u32 %v3010_v59, %v2551_v58  ;;  %v2524_v19 = vor.u32 %v2998_v8, %v2521_v12  ;;  %v3066_v58 = vld [vmem:[#allocation14 + $0xb8] sm:$0xff]  ;;  %v3061_v12 = vld [vmem:[#allocation14 + $0x90] sm:$0xff] }
 0x432   : > { %v3074_v59 = vld [vmem:[#allocation14 + $0xf8] sm:$0xff] }
 0x433   : > { %1406 = vmatpush.bf16.msra.mxu2 %v2552_v61  ;;  %v3065_v61 = vld [vmem:[#allocation14 + $0xb0] sm:$0xff]  ;;  %v3062_v8 = vld [vmem:[#allocation14 + $0x98] sm:$0xff] }
 0x434   : > { %1378 = vmatpush.bf16.msrb.mxu0 %v2608_v27  ;;  %v2488_v27 = vor.u32 %v2994_v22, %v2487_v20  ;;  %v3051_v20 = vld [vmem:[#allocation14 + $0x40] sm:$0xff]  ;;  %v3082_v22 = vld [vmem:[#allocation14 + $0x138] sm:$0xff] }
 0x435   : > { %1415 = vmatpush.bf16.msrb.mxu3 %v2684_v11  ;;  %v2516_v11 = vor.u32 %v2997_v5, %v2513_v6  ;;  %v3063_v5 = vld [vmem:[#allocation14 + $0xa0] sm:$0xff] }
 0x436   : > { %v3071_v6 = vld [vmem:[#allocation14 + $0xe0] sm:$0xff] }
 0x437   : > { %1394 = vmatpush.bf16.msra.mxu1 %v2516_v11  ;;  %v3053_v11 = vld [vmem:[#allocation14 + $0x50] sm:$0xff] }
 0x438   : > { %1379 = vmatpush.bf16.msrb.mxu0 %v2576_v42 }
 0x439   : > { %1416 = vmatpush.bf16.msrb.mxu3 %v2652_v23  ;;  %v2990_v23 = vld [vmem:[#allocation11 + $0x5c] sm:$0xf] }
 0x43b   : > { %1395 = vmatpush.bf16.msra.mxu1 %v2484_v21  ;;  %v3098_v21 = vld [vmem:[#allocation14 + $0x1b8] sm:$0xff] }
 0x43c   : > { %1380 = vmatpush.bf16.msrb.mxu0 %v2544_v56  ;;  %v3050_v56 = vld [vmem:[#allocation14 + $0x38] sm:$0xff] }
 0x43d   : > { %1417 = vmatpush.bf16.msrb.mxu3 %v2620_v37  ;;  %v2457_v37 = vld [vmem:[#allocation11 + $0x38] sm:$0xf0] }
 0x43e   : > { %v2460_v44 = vor.u32 %v2982_v35, %v2457_v37  ;;  %v3087_v35 = vld [vmem:[#allocation14 + $0x160] sm:$0xff]  ;;  %v3096_v37 = vld [vmem:[#allocation14 + $0x1a8] sm:$0xff] }
 0x43f   : > { %1396 = vmatpush.bf16.msra.mxu1 %v2452_v40  ;;  %v3086_v40 = vld [vmem:[#allocation14 + $0x158] sm:$0xff] }
 0x440   : > { %1381 = vmatpush.bf16.msrb.mxu0 %v2512_v10  ;;  %v3045_v10 = vld [vmem:[#allocation14 + $0x10] sm:$0xff] }
 0x441   : > { %1418 = vmatpush.bf16.msrb.mxu3 %v2588_v0  ;;  %v917_v0 = vperm.slane %v3873_v30, 2  ;;  %v3073_v30 = vld [vmem:[#allocation14 + $0xf0] sm:$0xff] }
 0x444   : > { %1382 = vmatpush.bf16.msrb.mxu0 %v2480_v25  ;;  %v3067_v25 = vld [vmem:[#allocation14 + $0xc0] sm:$0xff] }
 0x445   : > { %1419 = vmatpush.bf16.msrb.mxu3 %v2556_v3  ;;  %v3047_v3 = vld [vmem:[#allocation14 + $0x20] sm:$0xff] }
 0x448   : > { %1383 = vmatpush.bf16.msrb.mxu0 %v2448_v39  ;;  %v3078_v39 = vld [vmem:[#allocation14 + $0x118] sm:$0xff] }
 0x449   : > { %1420 = vmatpush.bf16.msrb.mxu3 %v2524_v19  ;;  %v3043_v19 = vld [vmem:[#allocation14] sm:$0xff] }
 0x48c   : > { %v896_v24 = vpop.xlane.xlu2 %895 }
 0x48d   : > { %v3898_v41 = vmul.f32 %v896_v24, %v3869_v15  ;;  %v2489_v24 = vld [vmem:[#allocation11 + $0x78] sm:$0xf0] }
 0x48e   : > { %v2492_v32 = vor.u32 %v2990_v23, %v2489_v24  ;;  %v3090_v23 = vld [vmem:[#allocation14 + $0x178] sm:$0xff]  ;;  %v3059_v24 = vld [vmem:[#allocation14 + $0x80] sm:$0xff] }
 0x48f   : > { %v902_v54 = vmul.f32 %v3898_v41, %v3898_v41  ;;  %v904_v49 = vsub.f32 %v3892_v36, %v3898_v41  ;;  %v3049_v41 = vld [vmem:[#allocation14 + $0x30] sm:$0xff] }
 0x490   : > { %1421 = vmatpush.bf16.msrb.mxu3 %v2492_v32  ;;  %v3097_v32 = vld [vmem:[#allocation14 + $0x1b0] sm:$0xff] }
 0x494   : > { %v900_v50 = vpop.xlane.xlu2 %899  ;;  %1422 = vmatpush.bf16.msrb.mxu3 %v2460_v44  ;;  %v3077_v44 = vld [vmem:[#allocation14 + $0x110] sm:$0xff] }
 0x495   : > { %v901_v55 = vmul.f32 %v900_v50, %v3869_v15  ;;  %v3002_v15 = vld [vmem:[#allocation11 + $0xb4] sm:$0xf0] }
 0x496   : > { %v2520_v14 = vor.u32 %v3002_v15, %v2519_v7  ;;  %v3046_v7 = vld [vmem:[#allocation14 + $0x18] sm:$0xff] }
 0x497   : > { %v903_v2 = vsub.f32 %v901_v55, %v902_v54  ;;  %v3054_v15 = vld [vmem:[#allocation14 + $0x58] sm:$0xff] }
 0x498   : > { %1407 = vmatpush.bf16.msra.mxu2 %v2520_v14  ;;  %v3044_v14 = vld [vmem:[#allocation14 + $0x8] sm:$0xff] }
 0x499   : > { %v905_v9 = vadd.f32 1e-05, %v903_v2  ;;  %v3072_v2 = vld [vmem:[#allocation14 + $0xe8] sm:$0xff] }
 0x49b   : > { %3240 = vrsqrt.f32 %v905_v9  ;;  %vm912_vm8 = vweird.f32 %v905_v9 }
 0x49c   : > { %1408 = vmatpush.bf16.msra.mxu2 %v2488_v27  ;;  %v3081_v27 = vld [vmem:[#allocation14 + $0x130] sm:$0xff] }
 0x4a0   : > { %1409 = vmatpush.bf16.msra.mxu2 %v2456_v43  ;;  %v3103_v43 = vld [vmem:[#allocation14 + $0x1e0] sm:$0xff] }
 0x4a1   : > { %v3241_v38 = vpop.eup %3240 }
 0x4a2   : > { %v907_v42 = vmul.f32 %v3241_v38, %v905_v9  ;;  %vm913_vm7 = vweird.f32 %v3241_v38  ;;  %v3070_v9 = vld [vmem:[#allocation14 + $0xd8] sm:$0xff] }
 0x4a3   : > { %vm914_vm9 = vmor %vm912_vm8, %vm913_vm7 }
 0x4a4   : > { %v908_v45 = vmul.f32 %v3241_v38, %v907_v42  ;;  %v3095_v42 = vld [vmem:[#allocation14 + $0x1a0] sm:$0xff] }
 0x4a6   : > { %v909_v46 = vmul.f32 0.5, %v908_v45  ;;  %v3085_v45 = vld [vmem:[#allocation14 + $0x150] sm:$0xff] }
 0x4a8   : > { %v910_v47 = vsub.f32 1.5, %v909_v46  ;;  %v3094_v46 = vld [vmem:[#allocation14 + $0x198] sm:$0xff] }
 0x4aa   : > { %v911_v48 = vmul.f32 %v3241_v38, %v910_v47  ;;  %v3102_v47 = vld [vmem:[#allocation14 + $0x1d8] sm:$0xff] }
 0x4ac   : > { %v915_v50 = vsel %vm914_vm9, %v3241_v38, %v911_v48  ;;  %v3104_v38 = vld [vmem:[#allocation14 + $0x1e8] sm:$0xff] }
 0x4ad   : > { %v916_v52 = vmul.f32 %v915_v50, %v904_v49  ;;  %v3076_v48 = vld [vmem:[#allocation14 + $0x108] sm:$0xff]  ;;  %v3101_v50 = vld [vmem:[#allocation14 + $0x1d0] sm:$0xff] }
 0x4ae   : > { %v3084_v49 = vld [vmem:[#allocation14 + $0x148] sm:$0xff] }
 0x4af   : > { %v918_v53 = vmul.f32 %v917_v0, %v916_v52  ;;  %v3093_v0 = vld [vmem:[#allocation14 + $0x190] sm:$0xff]  ;;  %v3083_v52 = vld [vmem:[#allocation14 + $0x140] sm:$0xff] }
 0x4b1   : > { %v920_v54 = vadd.f32 %v919_v51, %v918_v53  ;;  %v3075_v51 = vld [vmem:[#allocation14 + $0x100] sm:$0xff]  ;;  %v3092_v53 = vld [vmem:[#allocation14 + $0x188] sm:$0xff] }
 0x4b3   : > { %v921_v55 = vpack.c.bf16 %v920_v54, %v920_v54  ;;  %v3100_v54 = vld [vmem:[#allocation14 + $0x1c8] sm:$0xff] }
 0x4b5   : > { %1332 = vmatmul.bf16.vlgmr.msra.gmra.mxu0 %v921_v55  ;;  %1345 = vmatmul.bf16.vlgmr.msrb.gmra.mxu1 %v921_v55 }
 0x4b6   : > { %1358 = vmatmul.bf16.vlgmr.msrb.gmra.mxu2 %v921_v55  ;;  %1371 = vmatmul.bf16.vlgmr.msra.gmra.mxu3 %v921_v55 }
 0x4b7   : > { %1957 = vmatpush.bf16.msra.mxu0 %v3050_v56  ;;  %1970 = vmatpush.bf16.msrb.mxu1 %v3058_v57  ;;  %v3099_v56 = vld [vmem:[#allocation14 + $0x1c0] sm:$0xff]  ;;  %v986_v57 = vld [vmem:[#allocation13] sm:$0xff] }
 0x4b8   : > { %1983 = vmatpush.bf16.msrb.mxu2 %v3066_v58  ;;  %1996 = vmatpush.bf16.msra.mxu3 %v3074_v59  ;;  %v988_v58 = vperm.slane %v986_v57, 0  ;;  %v989_v59 = vperm.slane %v986_v57, 1 }
 0x4bb   : > { %1958 = vmatpush.bf16.msra.mxu0 %v3049_v41  ;;  %1971 = vmatpush.bf16.msrb.mxu1 %v3057_v60 }
 0x4bc   : > { %1984 = vmatpush.bf16.msrb.mxu2 %v3065_v61  ;;  %1997 = vmatpush.bf16.msra.mxu3 %v3073_v30 }
 0x4bf   : > { %1959 = vmatpush.bf16.msra.mxu0 %v3048_v62  ;;  %1972 = vmatpush.bf16.msrb.mxu1 %v3056_v63 }
 0x4c0   : > { %1985 = vmatpush.bf16.msrb.mxu2 %v3064_v1  ;;  %1998 = vmatpush.bf16.msra.mxu3 %v3072_v2  ;;  %v990_v1 = vperm.slane %v986_v57, 2  ;;  %v991_v2 = vperm.slane %v986_v57, 3 }
 0x4c3   : > { %1960 = vmatpush.bf16.msra.mxu0 %v3047_v3  ;;  %1973 = vmatpush.bf16.msrb.mxu1 %v3055_v4 }
 0x4c4   : > { %1986 = vmatpush.bf16.msrb.mxu2 %v3063_v5  ;;  %1999 = vmatpush.bf16.msra.mxu3 %v3071_v6 }
 0x4c5   : > { %1384 = vmatmul.bf16.vlgmr.msrb.gmra.mxu0 %v921_v55  ;;  %1397 = vmatmul.bf16.vlgmr.msra.gmra.mxu1 %v921_v55 }
 0x4c6   : > { %1410 = vmatmul.bf16.vlgmr.msra.gmra.mxu2 %v921_v55  ;;  %1423 = vmatmul.bf16.vlgmr.msrb.gmra.mxu3 %v921_v55  ;;  %v3091_v55 = vld [vmem:[#allocation14 + $0x180] sm:$0xff] }
 0x4c7   : > { %1961 = vmatpush.bf16.msra.mxu0 %v3046_v7  ;;  %1974 = vmatpush.bf16.msrb.mxu1 %v3054_v15 }
 0x4c8   : > { %1987 = vmatpush.bf16.msrb.mxu2 %v3062_v8  ;;  %2000 = vmatpush.bf16.msra.mxu3 %v3070_v9 }
 0x4cb   : > { %1962 = vmatpush.bf16.msra.mxu0 %v3045_v10  ;;  %1975 = vmatpush.bf16.msrb.mxu1 %v3053_v11 }
 0x4cc   : > { %1988 = vmatpush.bf16.msrb.mxu2 %v3061_v12  ;;  %2001 = vmatpush.bf16.msra.mxu3 %v3069_v13 }
 0x4cf   : > { %1963 = vmatpush.bf16.msra.mxu0 %v3044_v14  ;;  %1976 = vmatpush.bf16.msrb.mxu1 %v3052_v16  ;;  %v992_v14 = vperm.slane %v986_v57, 4  ;;  %v993_v16 = vperm.slane %v986_v57, 5 }
 0x4d0   : > { %1989 = vmatpush.bf16.msrb.mxu2 %v3060_v17  ;;  %2002 = vmatpush.bf16.msra.mxu3 %v3068_v18 }
 0x4d3   : > { %1964 = vmatpush.bf16.msra.mxu0 %v3043_v19  ;;  %1977 = vmatpush.bf16.msrb.mxu1 %v3051_v20 }
 0x4d4   : > { %1990 = vmatpush.bf16.msrb.mxu2 %v3059_v24  ;;  %2003 = vmatpush.bf16.msra.mxu3 %v3067_v25 }
 0x4d7   : > { %2009 = vmatpush.bf16.msrb.mxu0 %v3082_v22  ;;  %2022 = vmatpush.bf16.msra.mxu1 %v3090_v23 }
 0x4d8   : > { %2035 = vmatpush.bf16.msra.mxu2 %v3098_v21  ;;  %2048 = vmatpush.bf16.msrb.mxu3 %v3106_v26  ;;  %v994_v21 = vperm.slane %v986_v57, 6  ;;  %v995_v26 = vperm.slane %v986_v57, 7 }
 0x4db   : > { %2010 = vmatpush.bf16.msrb.mxu0 %v3081_v27  ;;  %2023 = vmatpush.bf16.msra.mxu1 %v3089_v28 }
 0x4dc   : > { %2036 = vmatpush.bf16.msra.mxu2 %v3097_v32  ;;  %2049 = vmatpush.bf16.msrb.mxu3 %v3105_v33 }
 0x4df   : > { %2011 = vmatpush.bf16.msrb.mxu0 %v3080_v29  ;;  %2024 = vmatpush.bf16.msra.mxu1 %v3088_v31 }
 0x4e0   : > { %2037 = vmatpush.bf16.msra.mxu2 %v3096_v37  ;;  %2050 = vmatpush.bf16.msrb.mxu3 %v3104_v38 }
 0x4e3   : > { %2012 = vmatpush.bf16.msrb.mxu0 %v3079_v34  ;;  %2025 = vmatpush.bf16.msra.mxu1 %v3087_v35 }
 0x4e4   : > { %2038 = vmatpush.bf16.msra.mxu2 %v3095_v42  ;;  %2051 = vmatpush.bf16.msrb.mxu3 %v3103_v43 }
 0x4e7   : > { %2013 = vmatpush.bf16.msrb.mxu0 %v3078_v39  ;;  %2026 = vmatpush.bf16.msra.mxu1 %v3086_v40 }
 0x4e8   : > { %2039 = vmatpush.bf16.msra.mxu2 %v3094_v46  ;;  %2052 = vmatpush.bf16.msrb.mxu3 %v3102_v47 }
 0x4eb   : > { %2014 = vmatpush.bf16.msrb.mxu0 %v3077_v44  ;;  %2027 = vmatpush.bf16.msra.mxu1 %v3085_v45 }
 0x4ec   : > { %2040 = vmatpush.bf16.msra.mxu2 %v3093_v0  ;;  %2053 = vmatpush.bf16.msrb.mxu3 %v3101_v50 }
 0x4ef   : > { %2015 = vmatpush.bf16.msrb.mxu0 %v3076_v48  ;;  %2028 = vmatpush.bf16.msra.mxu1 %v3084_v49 }
 0x4f0   : > { %2041 = vmatpush.bf16.msra.mxu2 %v3092_v53  ;;  %2054 = vmatpush.bf16.msrb.mxu3 %v3100_v54 }
 0x4f3   : > { %2016 = vmatpush.bf16.msrb.mxu0 %v3075_v51  ;;  %2029 = vmatpush.bf16.msra.mxu1 %v3083_v52 }
 0x4f4   : > { %2042 = vmatpush.bf16.msra.mxu2 %v3091_v55  ;;  %2055 = vmatpush.bf16.msrb.mxu3 %v3099_v56 }
 0x532   : > { %v1333_v41 = vpop.f32.mrf.mxu0  ;;  %v1346_v60 = vpop.f32.mrf.mxu1 }
 0x533   : > { %v1334_v61 = vadd.f32 %v1333_v41, %v988_v58  ;;  %v1347_v30 = vadd.f32 %v1346_v60, %v989_v59 }
 0x535   : > { %v1428_v62 = vmax.f32 %v1334_v61, 0.0  ;;  %v1429_v63 = vmax.f32 %v1347_v30, 0.0 }
 0x537   : > { %v1436_v3 = vpack.c.bf16 %v1428_v62, %v1428_v62  ;;  %v1437_v4 = vpack.c.bf16 %v1429_v63, %v1429_v63 }
 0x539   : > { %v1359_v5 = vpop.f32.mrf.mxu2  ;;  %v1372_v6 = vpop.f32.mrf.mxu3  ;;  %1965 = vmatmul.bf16.vlgmr.msra.gmra.mxu0 %v1436_v3  ;;  %1978 = vmatmul.bf16.vlgmr.msrb.gmra.mxu1 %v1437_v4 }
 0x53a   : > { %v1360_v7 = vadd.f32 %v1359_v5, %v990_v1  ;;  %v1373_v15 = vadd.f32 %v1372_v6, %v991_v2  ;;  %v1335_v8 = vpop.f32.mrf.mxu0  ;;  %v1348_v9 = vpop.f32.mrf.mxu1 }
 0x53c   : > { %v1430_v10 = vmax.f32 %v1360_v7, 0.0  ;;  %v1431_v11 = vmax.f32 %v1373_v15, 0.0 }
 0x53e   : > { %v1438_v12 = vpack.c.bf16 %v1430_v10, %v1430_v10  ;;  %v1439_v13 = vpack.c.bf16 %v1431_v11, %v1431_v11 }
 0x540   : > { %1991 = vmatmul.bf16.vlgmr.msrb.gmra.mxu2 %v1438_v12  ;;  %2004 = vmatmul.bf16.vlgmr.msra.gmra.mxu3 %v1439_v13 }
 0x541   : > { %v1361_v17 = vpop.f32.mrf.mxu2  ;;  %v1374_v18 = vpop.f32.mrf.mxu3 }
 0x542   : > { %v1385_v19 = vpop.f32.mrf.mxu0  ;;  %v1398_v20 = vpop.f32.mrf.mxu1 }
 0x543   : > { %v1386_v22 = vadd.f32 %v1385_v19, %v992_v14  ;;  %v1399_v23 = vadd.f32 %v1398_v20, %v993_v16 }
 0x545   : > { %v1432_v24 = vmax.f32 %v1386_v22, 0.0  ;;  %v1433_v25 = vmax.f32 %v1399_v23, 0.0 }
 0x547   : > { %v1440_v27 = vpack.c.bf16 %v1432_v24, %v1432_v24  ;;  %v1441_v28 = vpack.c.bf16 %v1433_v25, %v1433_v25 }
 0x549   : > { %v1411_v29 = vpop.f32.mrf.mxu2  ;;  %v1424_v31 = vpop.f32.mrf.mxu3  ;;  %2017 = vmatmul.bf16.vlgmr.msrb.gmra.mxu0 %v1440_v27  ;;  %2030 = vmatmul.bf16.vlgmr.msra.gmra.mxu1 %v1441_v28 }
 0x54a   : > { %v1412_v32 = vadd.f32 %v1411_v29, %v994_v21  ;;  %v1425_v33 = vadd.f32 %v1424_v31, %v995_v26  ;;  %v1387_v34 = vpop.f32.mrf.mxu0  ;;  %v1400_v35 = vpop.f32.mrf.mxu1 }
 0x54c   : > { %v1434_v37 = vmax.f32 %v1412_v32, 0.0  ;;  %v1435_v38 = vmax.f32 %v1425_v33, 0.0 }
 0x54e   : > { %v1442_v39 = vpack.c.bf16 %v1434_v37, %v1434_v37  ;;  %v1443_v40 = vpack.c.bf16 %v1435_v38, %v1435_v38 }
 0x550   : > { %2043 = vmatmul.bf16.vlgmr.msra.gmra.mxu2 %v1442_v39  ;;  %2056 = vmatmul.bf16.vlgmr.msrb.gmra.mxu3 %v1443_v40 }
 0x551   : > { %v1413_v42 = vpop.f32.mrf.mxu2  ;;  %v1426_v43 = vpop.f32.mrf.mxu3 }
 0x552   : > { %3510 = shalt.err (!%p3507_p8)
}
 0x553   : > { %3136 = dma.vmem_to_hbm [thread:$0]  (%p3770_p5), %s2098_s6, 64, %s2100_s19, %s2071_s26   ;;  %v3242_v46 = vld [vmem:[#allocation7] sm:$0x3f] }
 0x554   : > { %v1572_v47 = vperm.slane %v3242_v46, 5  ;;  %s2943_s28 = sshll.u32 %s3695_s20, 3  ;;  %s510_s8 = scalar_lea.vmem [#allocation16], %s2291_s2 }
 0x555   : > { %s2081_s7 = scalar_lea.hbm %s3968_s9, %s2943_s28  ;;  %s2083_s18 = sshll.u32 %s510_s8, 4  ;;  %s2084_s18 = int_to_ptr.vmem [resolvable:$true] %s2083_s18 }
 0x556   : > { %s2085_s22 = sshll.u32 %s2081_s7, 4  ;;  %s2066_s20 = scalar_lea.sflag [#allocation4], %s3823_s5  ;;  %s2086_s22 = int_to_ptr.hbm [resolvable:$true] %s2085_s22 }
 0x557   : > { %s3525_s6 = sshra.s32 %s2086_s22, 4  ;;  %s3531_s24 = scalar_lea.hbm %s3968_s9, 16  ;;  %s3526_s6 = int_to_ptr.hbm [resolvable:$true] %s3525_s6 }
 0x558   : > { %s3527_s19 = scalar_lea.hbm %s3526_s6, 8  ;;  %p3532_p0 = scmp.lt.s32.totalorder %s3526_s6, %s3968_s9 }
 0x559   : > { %p3528_p10 = scmp.ne.s32.totalorder %s3526_s6, %s3527_s19  ;;  %p3533_p2 = scmp.lt.s32.totalorder %s3531_s24, %s3527_s19 }
 0x55b   : > { %p3529_p13 = pnand %p3528_p10, %p3770_p5  ;;  %p3534_p1 = por %p3533_p2, %p3532_p0 }
 0x55d   : > { %p3530_p11 = pneg %p3529_p13 }
 0x55f   : > { %p3535_p3 = pnand %p3534_p1, %p3530_p11 }
 0x5b6   : > { %v1966_v44 = vpop.f32.mrf.mxu0  ;;  %v1979_v45 = vpop.f32.mrf.mxu1 }
 0x5b7   : > { %v1967_v0 = vadd.f32 %v1966_v44, %v1572_v47 }
 0x5b9   : > { %v1980_v52 = vadd.f32 %v1979_v45, %v1967_v0 }
 0x5be   : > { %v1968_v48 = vpop.f32.mrf.mxu0  ;;  %v1981_v49 = vpop.f32.mrf.mxu1 }
 0x5c3   : > { %v1992_v50 = vpop.f32.mrf.mxu2  ;;  %v2005_v51 = vpop.f32.mrf.mxu3 }
 0x5c4   : > { %v1993_v53 = vadd.f32 %v1992_v50, %v1980_v52 }
 0x5c6   : > { %v2018_v54 = vpop.f32.mrf.mxu0  ;;  %v2031_v55 = vpop.f32.mrf.mxu1  ;;  %v2006_v56 = vadd.f32 %v2005_v51, %v1993_v53 }
 0x5c8   : > { %v2019_v59 = vadd.f32 %v2018_v54, %v2006_v56 }
 0x5ca   : > { %v2032_v61 = vadd.f32 %v2031_v55, %v2019_v59 }
 0x5cb   : > { %v1994_v57 = vpop.f32.mrf.mxu2  ;;  %v2007_v58 = vpop.f32.mrf.mxu3 }
 0x5ce   : > { %v2020_v41 = vpop.f32.mrf.mxu0  ;;  %v2033_v60 = vpop.f32.mrf.mxu1 }
 0x5d3   : > { %v2044_v30 = vpop.f32.mrf.mxu2  ;;  %v2057_v62 = vpop.f32.mrf.mxu3 }
 0x5d4   : > { %v2045_v63 = vadd.f32 %v2044_v30, %v2032_v61 }
 0x5d6   : > { %v2058_v1 = vadd.f32 %v2057_v62, %v2045_v63 }
 0x5d8   : > { %v2061_v2 = vadd.f32 %v2058_v1, %v3892_v36 }
 0x5da   : > { %2062 = vst [vmem:[%s510_s8] sm:$0xff] %v2061_v2 }
 0x5db   : > { %v2046_v3 = vpop.f32.mrf.mxu2  ;;  %v2059_v4 = vpop.f32.mrf.mxu3 }
 0x5dc   : > { %3538 = shalt.err (!%p3535_p3)
}
 0x5dd   : > { %3135 = dma.vmem_to_hbm [thread:$0]  (%p3770_p5), %s2084_s18, 128, %s2086_s22, %s2066_s20  }
 0x5de PF: > { %s2111_s5 = sand.u32 1, %s3589_s13   ;;  %p3992_p12 = scmp.ge.s32.totalorder %s3601_s16, 2 }
 0x5df   : > { %s2112_s15 = scalar_lea.sflag [#allocation4], %s2111_s5 }
 0x5e0   : > { %p3166_p7 = pnand %p3992_p12, %p3774_p6 }
 0x5e2   : > { %p3167_p9 = pneg %p3166_p7 }
 0x5e4   : > { %3580 = dma.done.wait (%p3167_p9), %s2112_s15, 128  }
 0x5e5   : > { %3582 = vsyncadd (%p3167_p9), %s2112_s15, 4294967168  ;;  %s2122_s21 = scalar_lea.sflag [#allocation18], %s2111_s5 }
 0x5e6   : > { %3584 = dma.done.wait (%p3167_p9), %s2122_s21, 64  }
 0x5e7   : > { %3586 = vsyncadd (%p3167_p9), %s2122_s21, 4294967232  ;;  %s3993_s11 = sld [smem:[#allocation27_spill]]  ;;  %p33_p5 = scmp.ge.s32.totalorder %s3742_s23, 4  }
 0x5e8   : > { %s3994_s15 = sld [smem:[#allocation28_spill]]  ;;  %s3995_s13 = smov %s3593_s14 }
 0x5e9   : > { %s3997_s16 = smov %s3742_s23  ;;  %35 = sbr.rel (!%p33_p5) target bundleno = 19 (0x13), region = 155 }
 0x5ed   : > { %s3996_s14 = smov %s3993_s11 }
 0x5ee   :  { %2128 = vsyncpa [#allocation3], 1 }
 0x5ef   :  { %2130 = vsyncpa [#allocation3 + $0x1], 1 }
 0x5f0   :  { %2131 = vsyncpa [#allocation6], 1 }
 0x5f1   :  { %2133 = vsyncpa [#allocation6 + $0x1], 1 }
 0x5f2   :  { %2134 = vsyncpa [#allocation9], 1 }
 0x5f3   :  { %2135 = vsyncpa [#allocation12], 1 }
 0x5f4   :  { %2136 = vsyncpa [#allocation15], 1 }
 0x5f5   :  { %2137 = vsyncpa [#allocation4], 1 }
 0x5f6   :  { %2139 = vsyncpa [#allocation4 + $0x1], 1 }
 0x5f7   :  { %2140 = vsyncpa [#allocation18], 1 }
 0x5f8   :  { %2142 = vsyncpa [#allocation18 + $0x1], 1 }

</bundles_post_ra>
